<compile_context>
chip_gen: v5e
topology: v5e:2x2
jax: 0.10.0
libtpu: 0.0.40
codegen_flags: <defaults>
</compile_context>

<pallas_src>
import jax
import jax.numpy as jnp
from jax.experimental import pallas as pl
from jax.experimental.pallas import tpu as pltpu


def _mappo_critic_kernel(x_ref, w1_ref, b1_ref, w2_ref, b2_ref, w3_ref, b3_ref,
                         out_ref):
    # ---- Layer 1: Linear(state_dim -> hidden) + ReLU (bf16 matmul, f32 acc) ----
    h1 = jnp.dot(x_ref[...], w1_ref[...], preferred_element_type=jnp.float32)
    h1 = jnp.maximum(h1 + b1_ref[...], 0.0)                      # f32 VPU

    # ---- Layer 2: Linear(hidden -> hidden) + ReLU ----
    h2 = jnp.dot(h1.astype(jnp.bfloat16), w2_ref[...],
                 preferred_element_type=jnp.float32)
    h2 = jnp.maximum(h2 + b2_ref[...], 0.0)                      # f32 VPU

    # ---- Layer 3: Linear(hidden -> 1) as VPU multiply + lane reduction ----
    # (an [TB,H]@[H,1] MXU pass would use 1 output column; do it on VPU/XLU.)
    w3_row = w3_ref[...].astype(jnp.float32)                     # (1, H) f32
    v = jnp.sum(h2 * w3_row, axis=-1, keepdims=True)             # (TB, 1) f32
    out_ref[...] = (v + b3_ref[...]).astype(out_ref.dtype)


def _round_up(n, m):
    return ((n + m - 1) // m) * m


def mappo_critic_forward(x, params, *, block_batch=256):
    """x: [batch, state_dim] float32 -> value [batch, 1] float32."""
    w1, b1, w2, b2, w3, b3 = params
    batch, state_dim = x.shape
    hidden = w1.shape[1]

    # bf16 input stream halves HBM traffic; accumulation stays f32 in-kernel.
    x_bf16 = x.astype(jnp.bfloat16)

    # Batch tile: multiple of 8 sublanes, never larger than needed.
    tb = min(block_batch, _round_up(batch, 8))
    grid = (pl.cdiv(batch, tb),)

    # VMEM budget: double-buffered x/out tiles + resident weights + margin.
    bf16_b, f32_b = 2, 4
    x_tile_bytes = tb * state_dim * bf16_b
    out_tile_bytes = tb * 1 * f32_b
    weight_bytes = (state_dim * hidden + hidden * hidden + hidden) * bf16_b
    bias_bytes = (2 * hidden + 1) * f32_b
    vmem_budget = 2 * (x_tile_bytes + out_tile_bytes) + weight_bytes + bias_bytes
    vmem_limit = min(max(vmem_budget + (4 << 20), 32 << 20), 48 << 20)

    cost = pl.CostEstimate(
        flops=2 * batch * (state_dim * hidden + hidden * hidden + hidden),
        transcendentals=0,
        bytes_accessed=(x_bf16.size * bf16_b + weight_bytes + bias_bytes
                        + batch * f32_b),
    )

    return pl.pallas_call(
        _mappo_critic_kernel,
        out_shape=jax.ShapeDtypeStruct((batch, 1), jnp.float32),
        grid=grid,
        in_specs=[
            pl.BlockSpec((tb, state_dim), lambda i: (i, 0)),      # x (streamed)
            pl.BlockSpec((state_dim, hidden), lambda i: (0, 0)),  # w1 (resident)
            pl.BlockSpec((1, hidden), lambda i: (0, 0)),          # b1
            pl.BlockSpec((hidden, hidden), lambda i: (0, 0)),     # w2 (resident)
            pl.BlockSpec((1, hidden), lambda i: (0, 0)),          # b2
            pl.BlockSpec((1, hidden), lambda i: (0, 0)),          # w3 (row layout)
            pl.BlockSpec((1, 1), lambda i: (0, 0)),               # b3
        ],
        out_specs=pl.BlockSpec((tb, 1), lambda i: (i, 0)),
        compiler_params=pltpu.CompilerParams(
            dimension_semantics=("parallel",),   # megacore sharding on v7x
            vmem_limit_bytes=vmem_limit,
        ),
        cost_estimate=cost,
    )(x_bf16, w1, b1, w2, b2, w3, b3)


def init_params(key, state_dim, hidden_size):
    """Matches nn.Linear default init U(-1/sqrt(fan_in), 1/sqrt(fan_in)).

    w1/w2 stored [in, out] (transpose of PyTorch layout) in bf16;
    w3 stored as a [1, hidden] row in bf16; biases kept f32."""
    k1, k2, k3, k4, k5, k6 = jax.random.split(key, 6)

    def uni(k, shape, fan_in):
        bound = 1.0 / jnp.sqrt(jnp.float32(fan_in))
        return jax.random.uniform(k, shape, jnp.float32, -bound, bound)

    w1 = uni(k1, (state_dim, hidden_size), state_dim).astype(jnp.bfloat16)
    b1 = uni(k2, (1, hidden_size), state_dim)
    w2 = uni(k3, (hidden_size, hidden_size), hidden_size).astype(jnp.bfloat16)
    b2 = uni(k4, (1, hidden_size), hidden_size)
    w3 = uni(k5, (1, hidden_size), hidden_size).astype(jnp.bfloat16)
    b3 = uni(k6, (1, 1), hidden_size)
    return (w1, b1, w2, b2, w3, b3)


def reference_forward(x, params):
    """Pure-JAX reference with the same precision policy as the kernel."""
    w1, b1, w2, b2, w3, b3 = params
    xb = x.astype(jnp.bfloat16)
    h1 = jnp.maximum(
        jnp.dot(xb, w1, preferred_element_type=jnp.float32) + b1, 0.0)
    h2 = jnp.maximum(
        jnp.dot(h1.astype(jnp.bfloat16), w2,
                preferred_element_type=jnp.float32) + b2, 0.0)
    return jnp.sum(h2 * w3.astype(jnp.float32), axis=-1, keepdims=True) + b3


if __name__ == "__main__":
    key = jax.random.PRNGKey(0)
    kx, kp = jax.random.split(key)

    # Small but MXU-friendly test sizes: hidden matches the module default (256),
    # batch spans multiple grid steps including a partial final tile.
    batch = 600
    state_dim = 64
    hidden_size = 256

    x = jax.random.normal(kx, (batch, state_dim), jnp.float32)
    params = init_params(kp, state_dim, hidden_size)

    out = mappo_critic_forward(x, params)
    out = jax.block_until_ready(out)

    ref = reference_forward(x, params)
    assert out.shape == (batch, 1), out.shape
    assert jnp.allclose(out, ref, atol=1e-2, rtol=1e-2), (out, ref)

    print("KERNEL_OK")
</pallas_src>

<mosaic_0001>
module attributes {stable_mosaic.version = 11 : i64} {
  func.func @_mappo_critic_kernel(%arg0: i32, %arg1: memref<256x64xbf16, #tpu.memory_space<vmem>>, %arg2: memref<64x256xbf16, #tpu.memory_space<vmem>>, %arg3: memref<1x256xf32, #tpu.memory_space<vmem>>, %arg4: memref<256x256xbf16, #tpu.memory_space<vmem>>, %arg5: memref<1x256xf32, #tpu.memory_space<vmem>>, %arg6: memref<1x256xbf16, #tpu.memory_space<vmem>>, %arg7: memref<1x1xf32, #tpu.memory_space<vmem>>, %arg8: memref<256x1xf32, #tpu.memory_space<vmem>>) attributes {dimension_semantics = [#tpu.dimension_semantics<parallel>], iteration_bounds = array<i64: 3>, scalar_prefetch = 0 : i64, scratch_operands = 0 : i64, tpu.core_type = #tpu.core_type<tc>, window_params = [{transform_indices = @transform_0, window_bounds = array<i64: 256, 64>}, {pipeline_mode = #tpu.pipeline_mode<synchronous>, transform_indices = @transform_1, window_bounds = array<i64: 64, 256>}, {pipeline_mode = #tpu.pipeline_mode<synchronous>, transform_indices = @transform_2, window_bounds = array<i64: 1, 256>}, {pipeline_mode = #tpu.pipeline_mode<synchronous>, transform_indices = @transform_3, window_bounds = array<i64: 256, 256>}, {pipeline_mode = #tpu.pipeline_mode<synchronous>, transform_indices = @transform_4, window_bounds = array<i64: 1, 256>}, {pipeline_mode = #tpu.pipeline_mode<synchronous>, transform_indices = @transform_5, window_bounds = array<i64: 1, 256>}, {pipeline_mode = #tpu.pipeline_mode<synchronous>, transform_indices = @transform_6, window_bounds = array<i64: 1, 1>}, {transform_indices = @transform_7, window_bounds = array<i64: 256, 1>}]} {
    %c0 = arith.constant 0 : index
    %c0_0 = arith.constant 0 : index
    %0 = vector.load %arg1[%c0, %c0_0] : memref<256x64xbf16, #tpu.memory_space<vmem>>, vector<256x64xbf16>
    %c0_1 = arith.constant 0 : index
    %c0_2 = arith.constant 0 : index
    %1 = vector.load %arg2[%c0_1, %c0_2] : memref<64x256xbf16, #tpu.memory_space<vmem>>, vector<64x256xbf16>
    %cst = arith.constant dense<0.000000e+00> : vector<256x256xf32>
    %2 = tpu.matmul %0, %1, %cst {dimension_numbers = #tpu.dot_dimension_numbers<[1], [0], [0], [1], [0, 0, 1, 1], [], []>} : vector<256x64xbf16>, vector<64x256xbf16>, vector<256x256xf32> -> vector<256x256xf32>
    %c0_3 = arith.constant 0 : index
    %c0_4 = arith.constant 0 : index
    %3 = vector.load %arg3[%c0_3, %c0_4] : memref<1x256xf32, #tpu.memory_space<vmem>>, vector<1x256xf32>
    %4 = vector.broadcast %3 : vector<1x256xf32> to vector<256x256xf32>
    %5 = arith.addf %2, %4 : vector<256x256xf32>
    %cst_5 = arith.constant 0.000000e+00 : f32
    %6 = vector.broadcast %cst_5 : f32 to vector<256x256xf32>
    %7 = arith.maximumf %5, %6 : vector<256x256xf32>
    %8 = arith.truncf %7 : vector<256x256xf32> to vector<256x256xbf16>
    %c0_6 = arith.constant 0 : index
    %c0_7 = arith.constant 0 : index
    %9 = vector.load %arg4[%c0_6, %c0_7] : memref<256x256xbf16, #tpu.memory_space<vmem>>, vector<256x256xbf16>
    %cst_8 = arith.constant dense<0.000000e+00> : vector<256x256xf32>
    %10 = tpu.matmul %8, %9, %cst_8 {dimension_numbers = #tpu.dot_dimension_numbers<[1], [0], [0], [1], [0, 0, 1, 1], [], []>} : vector<256x256xbf16>, vector<256x256xbf16>, vector<256x256xf32> -> vector<256x256xf32>
    %c0_9 = arith.constant 0 : index
    %c0_10 = arith.constant 0 : index
    %11 = vector.load %arg5[%c0_9, %c0_10] : memref<1x256xf32, #tpu.memory_space<vmem>>, vector<1x256xf32>
    %12 = vector.broadcast %11 : vector<1x256xf32> to vector<256x256xf32>
    %13 = arith.addf %10, %12 : vector<256x256xf32>
    %cst_11 = arith.constant 0.000000e+00 : f32
    %14 = vector.broadcast %cst_11 : f32 to vector<256x256xf32>
    %15 = arith.maximumf %13, %14 : vector<256x256xf32>
    %c0_12 = arith.constant 0 : index
    %c0_13 = arith.constant 0 : index
    %16 = vector.load %arg6[%c0_12, %c0_13] : memref<1x256xbf16, #tpu.memory_space<vmem>>, vector<1x256xbf16>
    %17 = arith.extf %16 : vector<1x256xbf16> to vector<1x256xf32>
    %18 = vector.broadcast %17 : vector<1x256xf32> to vector<256x256xf32>
    %19 = arith.mulf %15, %18 : vector<256x256xf32>
    %cst_14 = arith.constant dense<0.000000e+00> : vector<256xf32>
    %20 = vector.multi_reduction <add>, %19, %cst_14 [1] : vector<256x256xf32> to vector<256xf32>
    %21 = vector.shape_cast %20 : vector<256xf32> to vector<256x1xf32>
    %c0_15 = arith.constant 0 : index
    %c0_16 = arith.constant 0 : index
    %22 = vector.load %arg7[%c0_15, %c0_16] : memref<1x1xf32, #tpu.memory_space<vmem>>, vector<1x1xf32>
    %23 = vector.broadcast %22 : vector<1x1xf32> to vector<256x1xf32>
    %24 = arith.addf %21, %23 : vector<256x1xf32>
    %c0_17 = arith.constant 0 : index
    %c0_18 = arith.constant 0 : index
    %25 = vector.load %arg8[%c0_17, %c0_18] : memref<256x1xf32, #tpu.memory_space<vmem>>, vector<256x1xf32>
    tpu.vector_store %arg8[%c0_17, %c0_18], %24 {strides = array<i32>} : memref<256x1xf32, #tpu.memory_space<vmem>>, vector<256x1xf32>,
    return
  }
  func.func @transform_0(%arg0: i32) -> (i32, i32) {
    %c0_i32 = arith.constant 0 : i32
    %c0_i32_0 = arith.constant 0 : i32
    return %arg0, %c0_i32 : i32, i32
  }
  func.func @transform_1(%arg0: i32) -> (i32, i32) {
    %c0_i32 = arith.constant 0 : i32
    %c0_i32_0 = arith.constant 0 : i32
    %c0_i32_1 = arith.constant 0 : i32
    return %c0_i32, %c0_i32_0 : i32, i32
  }
  func.func @transform_2(%arg0: i32) -> (i32, i32) {
    %c0_i32 = arith.constant 0 : i32
    %c0_i32_0 = arith.constant 0 : i32
    %c0_i32_1 = arith.constant 0 : i32
    return %c0_i32, %c0_i32_0 : i32, i32
  }
  func.func @transform_3(%arg0: i32) -> (i32, i32) {
    %c0_i32 = arith.constant 0 : i32
    %c0_i32_0 = arith.constant 0 : i32
    %c0_i32_1 = arith.constant 0 : i32
    return %c0_i32, %c0_i32_0 : i32, i32
  }
  func.func @transform_4(%arg0: i32) -> (i32, i32) {
    %c0_i32 = arith.constant 0 : i32
    %c0_i32_0 = arith.constant 0 : i32
    %c0_i32_1 = arith.constant 0 : i32
    return %c0_i32, %c0_i32_0 : i32, i32
  }
  func.func @transform_5(%arg0: i32) -> (i32, i32) {
    %c0_i32 = arith.constant 0 : i32
    %c0_i32_0 = arith.constant 0 : i32
    %c0_i32_1 = arith.constant 0 : i32
    return %c0_i32, %c0_i32_0 : i32, i32
  }
  func.func @transform_6(%arg0: i32) -> (i32, i32) {
    %c0_i32 = arith.constant 0 : i32
    %c0_i32_0 = arith.constant 0 : i32
    %c0_i32_1 = arith.constant 0 : i32
    return %c0_i32, %c0_i32_0 : i32, i32
  }
  func.func @transform_7(%arg0: i32) -> (i32, i32) {
    %c0_i32 = arith.constant 0 : i32
    %c0_i32_0 = arith.constant 0 : i32
    return %arg0, %c0_i32 : i32, i32
  }
}

</mosaic_0001>

<bundles_post_ra>
// kernel: tpu_custom_call.1
= control target key start
LH: loop header
LB: loop body
LE: loop exit
PB: predicated region body
PF: predicated region fallthrough
CT: control target
= control target key end

     0   :  { %s3444_s0 = inlined_call_operand.vmem [shape: bf16[600,64], index: 0, kind: input, shape index: {}]   ;;  %s3445_s1 = inlined_call_operand.vmem [shape: bf16[64,256], index: 1, kind: input, shape index: {}]   ;;  %s3446_s2 = inlined_call_operand.vmem [shape: f32[1,256], index: 2, kind: input, shape index: {}]   ;;  %s3447_s3 = inlined_call_operand.vmem [shape: bf16[256,256], index: 3, kind: input, shape index: {}]   ;;  %s3448_s4 = inlined_call_operand.vmem [shape: f32[1,256], index: 4, kind: input, shape index: {}]   ;;  %s3449_s5 = inlined_call_operand.vmem [shape: bf16[1,256], index: 5, kind: input, shape index: {}]   ;;  %s3450_s6 = inlined_call_operand.<no memory space> [shape: f32[1,1], index: 6, kind: input, shape index: {}]   ;;  %s3451_s7 = inlined_call_operand.vmem [shape: f32[600,1], index: 7, kind: output, shape index: {}]  }
   0x1   :  { %v12_v0 = vstv %s3450_s6 }
   0x2   :  { %13 = vst [vmem:[#allocation2] sm:$0x1] %v12_v0 }
   0x3   :  { %s2563_s26 = smov 0   ;;  %s2565_s27 = smov 0  }
   0x4   :  { %s2567_s28 = smov 0  }
   0x5 LB: > { %s2576_s6 = sadd.s32 4294967295, %s2486_s28   ;;  %s2578_s29 = sadd.s32 1, %s2486_s28   ;;  %s2486_s28 = sphi %s2567_s28, %s3460_s28   ;;  %s2482_s27 = sphi %s2565_s27, %s3459_s27   ;;  %s2478_s26 = sphi %s2563_s26, %s3458_s26  }
   0x6   : > { %s175_s30 = ssub.s32 %s2486_s28, %s2578_s29  ;;  %s178_s8 = sadd.s32 1, %s2482_s27 }
   0x7   : > { %p176_p0 = scmp.eq.s32.totalorder %s175_s30, 0  ;;  %p188_p1 = scmp.ne.s32.totalorder %s2482_s27, %s2478_s26 }
   0x8   : > { %p189_p2 = scmp.eq.s32.totalorder %s2576_s6, 2  ;;  %p1991_p3 = scmp.ge.s32.totalorder %s2486_s28, 1 }
   0x9   : > { %s2586_s9 = scalar_select %p176_p0, %s2482_s27, %s178_s8  }
   0xa   : > { %p2588_p4 = por %p189_p2, %p188_p1  ;;  %p248_p5 = scmp.lt.s32.totalorder %s2486_s28, 4 }
   0xc   : > { %p249_p6 = pnand %p1991_p3, %p248_p5 }
   0xd   : > { %s2629_s17 = sshll.u32 (!%p249_p6), %s2576_s6, 5  ;;  %s280_s18 = sand.u32 (!%p249_p6), 1, %s2478_s26  }
   0xe   : > { %252 = sbr.rel (%p249_p6) target bundleno = 766 (0x2fe), region = 48  ;;  %p288_p7 = scmp.lt.s32.totalorder (!%p249_p6), %s2629_s17, 74 }
   0xf   : > { %s1992_s19 = sshll.u32 (!%p249_p6), %s280_s18, 8 }
  0x10   : > { %s3142_s26 = scalar_lea.vmem (!%p249_p6), [#allocation3], %s1992_s19  }
  0x13   : > { %v2085_v1 = vld [vmem:[%s3445_s1 + $0x30] sm:$0xf]  ;;  %v2291_v2 = vld [vmem:[%s3445_s1 + $0x34] sm:$0xf0]  ;;  %v2290_v3 = vld [vmem:[%s3445_s1 + $0x34] sm:$0xf] }
  0x14   : > { %v2086_v4 = vor.u32 %v2291_v2, %v2085_v1  ;;  %v2087_v5 = vld [vmem:[%s3445_s1 + $0x38] sm:$0xf0]  ;;  %v2077_v6 = vld [vmem:[%s3445_s1 + $0x20] sm:$0xf]  ;;  %v2289_v7 = vld [vmem:[%s3445_s1 + $0x24] sm:$0xf0] }
  0x15   : > { %v2090_v8 = vor.u32 %v2290_v3, %v2087_v5  ;;  %v2288_v9 = vld [vmem:[%s3445_s1 + $0x24] sm:$0xf]  ;;  %v2079_v10 = vld [vmem:[%s3445_s1 + $0x28] sm:$0xf0]  ;;  %v2078_v11 = vor.u32 %v2289_v7, %v2077_v6  ;;  %v2069_v13 = vld [vmem:[%s3445_s1 + $0x10] sm:$0xf] }
  0x16   : > { %522 = vmatpush.bf16.msra.mxu0 %v2086_v4  ;;  %2327 = vmatpush.bf16.msra.mxu2 %v2086_v4  ;;  %v2082_v12 = vor.u32 %v2288_v9, %v2079_v10  ;;  %v2287_v14 = vld [vmem:[%s3445_s1 + $0x14] sm:$0xf0]  ;;  %v2286_v15 = vld [vmem:[%s3445_s1 + $0x14] sm:$0xf]  ;;  %v2071_v16 = vld [vmem:[%s3445_s1 + $0x18] sm:$0xf0] }
  0x17   : > { %611 = vmatpush.bf16.msra.mxu1 %v2090_v8  ;;  %2331 = vmatpush.bf16.msra.mxu3 %v2090_v8  ;;  %v2070_v17 = vor.u32 %v2287_v14, %v2069_v13  ;;  %v2061_v18 = vld [vmem:[%s3445_s1] sm:$0xf]  ;;  %v2074_v19 = vor.u32 %v2286_v15, %v2071_v16  ;;  %v2285_v20 = vld [vmem:[%s3445_s1 + $0x4] sm:$0xf0]  ;;  %v2284_v21 = vld [vmem:[%s3445_s1 + $0x4] sm:$0xf] }
  0x18   : > { %s289_s24 = scalar_select %p288_p7, %s2629_s17, 74  ;;  %v2063_v22 = vld [vmem:[%s3445_s1 + $0x8] sm:$0xf0]  ;;  %v2181_v23 = vld [vmem:[%s3447_s3 + $0x70] sm:$0xf]  ;;  %v2062_v27 = vor.u32 %v2285_v20, %v2061_v18  ;;  %vm469_vm0 = vcmask 523264  }
  0x19   : > { %v2307_v24 = vld [vmem:[%s3447_s3 + $0x74] sm:$0xf0]  ;;  %v2245_v25 = vld [vmem:[%s3447_s3 + $0xf0] sm:$0xf]  ;;  %v2066_v28 = vor.u32 %v2284_v21, %v2063_v22  ;;  %v2306_v34 = vld [vmem:[%s3447_s3 + $0x74] sm:$0xf] }
  0x1a   : > { %523 = vmatpush.bf16.msra.mxu0 %v2078_v11  ;;  %2328 = vmatpush.bf16.msra.mxu2 %v2078_v11  ;;  %s1994_s13 = sshll.u32 %s289_s24, 2  ;;  %v2323_v26 = vld [vmem:[%s3447_s3 + $0xf4] sm:$0xf0]  ;;  %v2182_v29 = vor.u32 %v2307_v24, %v2181_v23  ;;  %v2183_v35 = vld [vmem:[%s3447_s3 + $0x78] sm:$0xf0]  ;;  %vm1615_vm1 = vcmask 7168  }
  0x1b   : > { %612 = vmatpush.bf16.msra.mxu1 %v2082_v12  ;;  %2332 = vmatpush.bf16.msra.mxu3 %v2082_v12  ;;  %s2660_s21 = scalar_lea.vmem %s3444_s0, %s1994_s13  ;;  %v2246_v30 = vor.u32 %v2323_v26, %v2245_v25  ;;  %v2678_v36 = vor.u32 %v2306_v34, %v2183_v35  ;;  %v2322_v37 = vld [vmem:[%s3447_s3 + $0xf4] sm:$0xf]  ;;  %v2247_v38 = vld [vmem:[%s3447_s3 + $0xf8] sm:$0xf0]  ;;  %v2173_v39 = vld [vmem:[%s3447_s3 + $0x60] sm:$0xf] }
  0x1c   : > { %v2268_v31 = vld [vmem:[%s2660_s21] sm:$0xff]  ;;  %v2277_v32 = vld [vmem:[%s2660_s21 + $0x48] sm:$0xff]  ;;  %v2250_v40 = vor.u32 %v2322_v37, %v2247_v38  ;;  %v2278_v47 = vld [vmem:[%s2660_s21 + $0x50] sm:$0xff]  ;;  %s1656_s20 = ssub.s32 (%p2588_p4), 75, %s2629_s17  ;;  %s2324_s22 = sshll.u32 (%p2588_p4), %s2576_s6, 8 }
  0x1d   : > { %v2665_v33 = vld [vmem:[%s2660_s21 + $0x40] sm:$0xff]  ;;  %v2305_v41 = vld [vmem:[%s3447_s3 + $0x64] sm:$0xf0]  ;;  %v2175_v49 = vld [vmem:[%s3447_s3 + $0x68] sm:$0xf0]  ;;  %p1657_p8 = scmp.lt.s32.totalorder (%p2588_p4), %s1656_s20, 32  ;;  %s3309_s25 = scalar_lea.vmem (%p2588_p4), %s3451_s7, %s2324_s22  }
  0x1e   : > { %524 = vmatpush.bf16.msra.mxu0 %v2070_v17  ;;  %2329 = vmatpush.bf16.msra.mxu2 %v2070_v17  ;;  %v2237_v42 = vld [vmem:[%s3447_s3 + $0xe0] sm:$0xf]  ;;  %v2321_v43 = vld [vmem:[%s3447_s3 + $0xe4] sm:$0xf0]  ;;  %v2174_v44 = vor.u32 %v2305_v41, %v2173_v39  ;;  %v2304_v48 = vld [vmem:[%s3447_s3 + $0x64] sm:$0xf] }
  0x1f   : > { %613 = vmatpush.bf16.msra.mxu1 %v2074_v19  ;;  %2333 = vmatpush.bf16.msra.mxu3 %v2074_v19  ;;  %v2238_v45 = vor.u32 %v2321_v43, %v2237_v42  ;;  %v2269_v46 = vld [vmem:[%s2660_s21 + $0x8] sm:$0xff]  ;;  %v2711_v50 = vor.u32 %v2304_v48, %v2175_v49  ;;  %v2320_v51 = vld [vmem:[%s3447_s3 + $0xe4] sm:$0xf]  ;;  %v2165_v53 = vld [vmem:[%s3447_s3 + $0x50] sm:$0xf] }
  0x20   : > { %v2239_v52 = vld [vmem:[%s3447_s3 + $0xe8] sm:$0xf0]  ;;  %v2303_v55 = vld [vmem:[%s3447_s3 + $0x54] sm:$0xf0]  ;;  %v2229_v56 = vld [vmem:[%s3447_s3 + $0xd0] sm:$0xf] }
  0x21   : > { %v2242_v54 = vor.u32 %v2320_v51, %v2239_v52  ;;  %v2319_v57 = vld [vmem:[%s3447_s3 + $0xd4] sm:$0xf0]  ;;  %v2166_v58 = vor.u32 %v2303_v55, %v2165_v53  ;;  %v2270_v60 = vld [vmem:[%s2660_s21 + $0x10] sm:$0xff]  ;;  %v2231_v63 = vld [vmem:[%s3447_s3 + $0xd8] sm:$0xf0] }
  0x22   : > { %525 = vmatpush.bf16.msra.mxu0 %v2062_v27  ;;  %2330 = vmatpush.bf16.msra.mxu2 %v2062_v27  ;;  %v2230_v59 = vor.u32 %v2319_v57, %v2229_v56  ;;  %v2279_v61 = vld [vmem:[%s2660_s21 + $0x58] sm:$0xff]  ;;  %v2318_v62 = vld [vmem:[%s3447_s3 + $0xd4] sm:$0xf]  ;;  %v2157_v1 = vld [vmem:[%s3447_s3 + $0x40] sm:$0xf] }
  0x23   : > { %614 = vmatpush.bf16.msra.mxu1 %v2066_v28  ;;  %2334 = vmatpush.bf16.msra.mxu3 %v2066_v28  ;;  %v2234_v0 = vor.u32 %v2318_v62, %v2231_v63  ;;  %v2301_v2 = vld [vmem:[%s3447_s3 + $0x44] sm:$0xf0]  ;;  %v2302_v3 = vld [vmem:[%s3447_s3 + $0x54] sm:$0xf]  ;;  %v2167_v5 = vld [vmem:[%s3447_s3 + $0x58] sm:$0xf0] }
  0x24   : > { %v2158_v4 = vor.u32 %v2301_v2, %v2157_v1  ;;  %v2221_v6 = vld [vmem:[%s3447_s3 + $0xc0] sm:$0xf]  ;;  %v2317_v7 = vld [vmem:[%s3447_s3 + $0xc4] sm:$0xf0]  ;;  %v2762_v8 = vor.u32 %v2302_v3, %v2167_v5  ;;  %v2271_v10 = vld [vmem:[%s2660_s21 + $0x18] sm:$0xff] }
  0x25   : > { %2091 = vmatmul.msk.bf16.vlgmr.msra.gmra.mxu0 %vm469_vm0, %v2268_v31  ;;  %2100 = vmatmul.msk.bf16.vlgmr.msra.gmra.mxu2 %vm469_vm0, %v2277_v32  ;;  %v2222_v9 = vor.u32 %v2317_v7, %v2221_v6  ;;  %v2280_v11 = vld [vmem:[%s2660_s21 + $0x60] sm:$0xff]  ;;  %v2149_v12 = vld [vmem:[%s3447_s3 + $0x30] sm:$0xf]  ;;  %v2299_v13 = vld [vmem:[%s3447_s3 + $0x34] sm:$0xf0] }
  0x26   : > { %990 = vmatpush.bf16.msrb.mxu2 %v2182_v29  ;;  %2107 = vmatmul.msk.bf16.vlgmr.msra.gmra.mxu1 %vm469_vm0, %v2268_v31  ;;  %v2150_v14 = vor.u32 %v2299_v13, %v2149_v12  ;;  %v2316_v15 = vld [vmem:[%s3447_s3 + $0xc4] sm:$0xf]  ;;  %v2223_v16 = vld [vmem:[%s3447_s3 + $0xc8] sm:$0xf0]  ;;  %v2213_v20 = vld [vmem:[%s3447_s3 + $0xb0] sm:$0xf] }
  0x27   : > { %1079 = vmatpush.bf16.msrb.mxu3 %v2246_v30  ;;  %1168 = vmatpush.bf16.msrb.mxu0 %v2678_v36  ;;  %v2300_v17 = vld [vmem:[%s3447_s3 + $0x44] sm:$0xf]  ;;  %v2226_v18 = vor.u32 %v2316_v15, %v2223_v16  ;;  %v2159_v19 = vld [vmem:[%s3447_s3 + $0x48] sm:$0xf0]  ;;  %v2315_v21 = vld [vmem:[%s3447_s3 + $0xb4] sm:$0xf0] }
  0x28   : > { %2115 = vmatmul.msk.bf16.vlgmr.msra.gmra.mxu3 %vm469_vm0, %v2665_v33  ;;  %1257 = vmatpush.bf16.msrb.mxu1 %v2250_v40  ;;  %v2795_v22 = vor.u32 %v2300_v17, %v2159_v19  ;;  %v2214_v23 = vor.u32 %v2315_v21, %v2213_v20  ;;  %v2272_v24 = vld [vmem:[%s2660_s21 + $0x20] sm:$0xff]  ;;  %v2281_v25 = vld [vmem:[%s2660_s21 + $0x68] sm:$0xff]  ;;  %v2314_v29 = vld [vmem:[%s3447_s3 + $0xb4] sm:$0xf] }
  0x29   : > { %v2141_v26 = vld [vmem:[%s3447_s3 + $0x20] sm:$0xf]  ;;  %v2297_v27 = vld [vmem:[%s3447_s3 + $0x24] sm:$0xf0]  ;;  %v2215_v30 = vld [vmem:[%s3447_s3 + $0xb8] sm:$0xf0] }
  0x2a   : > { %991 = vmatpush.bf16.msrb.mxu2 %v2174_v44  ;;  %v2142_v28 = vor.u32 %v2297_v27, %v2141_v26  ;;  %v2298_v31 = vld [vmem:[%s3447_s3 + $0x34] sm:$0xf]  ;;  %v2151_v34 = vld [vmem:[%s3447_s3 + $0x38] sm:$0xf0]  ;;  %v2205_v35 = vld [vmem:[%s3447_s3 + $0xa0] sm:$0xf] }
  0x2b   : > { %1080 = vmatpush.bf16.msrb.mxu3 %v2238_v45  ;;  %1169 = vmatpush.bf16.msrb.mxu0 %v2711_v50  ;;  %v2313_v37 = vld [vmem:[%s3447_s3 + $0xa4] sm:$0xf0]  ;;  %v2828_v38 = vor.u32 %v2298_v31, %v2151_v34  ;;  %v2282_v41 = vld [vmem:[%s2660_s21 + $0x70] sm:$0xff]  ;;  %v2295_v43 = vld [vmem:[%s3447_s3 + $0x14] sm:$0xf0] }
  0x2c   : > { %1258 = vmatpush.bf16.msrb.mxu1 %v2242_v54  ;;  %v2206_v39 = vor.u32 %v2313_v37, %v2205_v35  ;;  %v2273_v40 = vld [vmem:[%s2660_s21 + $0x28] sm:$0xff]  ;;  %v2133_v42 = vld [vmem:[%s3447_s3 + $0x10] sm:$0xf]  ;;  %v2312_v45 = vld [vmem:[%s3447_s3 + $0xa4] sm:$0xf] }
  0x2d   : > { %v2134_v44 = vor.u32 %v2295_v43, %v2133_v42  ;;  %v2143_v49 = vld [vmem:[%s3447_s3 + $0x28] sm:$0xf0]  ;;  %v2274_v52 = vld [vmem:[%s2660_s21 + $0x30] sm:$0xff]  ;;  %v2283_v53 = vld [vmem:[%s2660_s21 + $0x78] sm:$0xff] }
  0x2e   : > { %992 = vmatpush.bf16.msrb.mxu2 %v2166_v58  ;;  %v2125_v54 = vld [vmem:[%s3447_s3] sm:$0xf]  ;;  %v2293_v55 = vld [vmem:[%s3447_s3 + $0x4] sm:$0xf0]  ;;  %v2197_v56 = vld [vmem:[%s3447_s3 + $0x90] sm:$0xf] }
  0x2f   : > { %1081 = vmatpush.bf16.msrb.mxu3 %v2230_v59  ;;  %1170 = vmatpush.bf16.msrb.mxu0 %v2762_v8  ;;  %v2126_v57 = vor.u32 %v2293_v55, %v2125_v54  ;;  %v2311_v58 = vld [vmem:[%s3447_s3 + $0x94] sm:$0xf0]  ;;  %v2310_v59 = vld [vmem:[%s3447_s3 + $0x94] sm:$0xf]  ;;  %v2189_v63 = vld [vmem:[%s3447_s3 + $0x80] sm:$0xf] }
  0x30   : > { %1259 = vmatpush.bf16.msrb.mxu1 %v2234_v0  ;;  %v2309_v0 = vld [vmem:[%s3447_s3 + $0x84] sm:$0xf0]  ;;  %v2294_v1 = vld [vmem:[%s3447_s3 + $0x14] sm:$0xf]  ;;  %v2135_v3 = vld [vmem:[%s3447_s3 + $0x18] sm:$0xf0] }
  0x31   : > { %v2190_v2 = vor.u32 %v2309_v0, %v2189_v63  ;;  %v2138_v5 = vor.u32 %v2294_v1, %v2135_v3  ;;  %v2292_v7 = vld [vmem:[%s3447_s3 + $0x4] sm:$0xf] }
  0x32   : > { %993 = vmatpush.bf16.msrb.mxu2 %v2158_v4  ;;  %v2191_v4 = vld [vmem:[%s3447_s3 + $0x88] sm:$0xf0] }
  0x33   : > { %1082 = vmatpush.bf16.msrb.mxu3 %v2222_v9  ;;  %1171 = vmatpush.bf16.msrb.mxu0 %v2795_v22  ;;  %v2127_v9 = vld [vmem:[%s3447_s3 + $0x8] sm:$0xf0] }
  0x34   : > { %1260 = vmatpush.bf16.msrb.mxu1 %v2226_v18 }
  0x35   : > { %2092 = vmatmul.msk.bf16.gmra.mxu0 %vm469_vm0, %v2269_v46  ;;  %2101 = vmatmul.msk.bf16.gmra.mxu2 %vm469_vm0, %v2278_v47 }
  0x36   : > { %2108 = vmatmul.msk.bf16.gmra.mxu1 %vm469_vm0, %v2269_v46  ;;  %994 = vmatpush.bf16.msrb.mxu2 %v2150_v14  ;;  %v2207_v46 = vld [vmem:[%s3447_s3 + $0xa8] sm:$0xf0] }
  0x37   : > { %1083 = vmatpush.bf16.msrb.mxu3 %v2214_v23  ;;  %1172 = vmatpush.bf16.msrb.mxu0 %v2828_v38  ;;  %v2210_v48 = vor.u32 %v2312_v45, %v2207_v46 }
  0x38   : > { %2116 = vmatmul.msk.bf16.gmra.mxu3 %vm469_vm0, %v2277_v32  ;;  %v2218_v32 = vor.u32 %v2314_v29, %v2215_v30 }
  0x3a   : > { %995 = vmatpush.bf16.msrb.mxu2 %v2142_v28  ;;  %1261 = vmatpush.bf16.msrb.mxu1 %v2218_v32 }
  0x3b   : > { %1084 = vmatpush.bf16.msrb.mxu3 %v2206_v39 }
  0x3e   : > { %996 = vmatpush.bf16.msrb.mxu2 %v2134_v44  ;;  %1262 = vmatpush.bf16.msrb.mxu1 %v2210_v48 }
  0x42   : > { %997 = vmatpush.bf16.msrb.mxu2 %v2126_v57 }
  0x45   : > { %2093 = vmatmul.msk.bf16.gmra.mxu0 %vm469_vm0, %v2270_v60  ;;  %2102 = vmatmul.msk.bf16.gmra.mxu2 %vm469_vm0, %v2279_v61 }
  0x46   : > { %2109 = vmatmul.msk.bf16.gmra.mxu1 %vm469_vm0, %v2270_v60  ;;  %v2199_v60 = vld [vmem:[%s3447_s3 + $0x98] sm:$0xf0]  ;;  %2335 = vmatpush.bf16.msra.mxu2 %v2678_v36  ;;  %v2308_v36 = vld [vmem:[%s3447_s3 + $0x84] sm:$0xf] }
  0x47   : > { %v2202_v62 = vor.u32 %v2310_v59, %v2199_v60  ;;  %v2194_v6 = vor.u32 %v2308_v36, %v2191_v4 }
  0x48   : > { %2117 = vmatmul.msk.bf16.gmra.mxu3 %vm469_vm0, %v2278_v47  ;;  %v2296_v47 = vld [vmem:[%s3447_s3 + $0x24] sm:$0xf] }
  0x49   : > { %v2146_v51 = vor.u32 %v2296_v47, %v2143_v49  ;;  %1263 = vmatpush.bf16.msrb.mxu1 %v2202_v62 }
  0x4a   : > { %2336 = vmatpush.bf16.msra.mxu2 %v2711_v50  ;;  %v343_v50 = vld [vmem:[%s3446_s2] sm:$0x3] }
  0x4b   : > { %1173 = vmatpush.bf16.msrb.mxu0 %v2146_v51  ;;  %v2917_v14 = vperm.slane %v343_v50, 0 }
  0x4d   : > { %1264 = vmatpush.bf16.msrb.mxu1 %v2194_v6 }
  0x4e   : > { %2337 = vmatpush.bf16.msra.mxu2 %v2762_v8  ;;  %v2915_v8 = vperm.slane %v343_v50, 1 }
  0x4f   : > { %1174 = vmatpush.bf16.msrb.mxu0 %v2138_v5 }
  0x52   : > { %2338 = vmatpush.bf16.msra.mxu2 %v2795_v22 }
  0x55   : > { %2094 = vmatmul.msk.bf16.gmra.mxu0 %vm469_vm0, %v2271_v10  ;;  %2103 = vmatmul.msk.bf16.gmra.mxu2 %vm469_vm0, %v2280_v11 }
  0x56   : > { %2110 = vmatmul.msk.bf16.gmra.mxu1 %vm469_vm0, %v2271_v10  ;;  %v2275_v10 = vld [vmem:[%s2660_s21 + $0x38] sm:$0xff]  ;;  %2339 = vmatpush.bf16.msra.mxu2 %v2828_v38 }
  0x58   : > { %2118 = vmatmul.msk.bf16.gmra.mxu3 %vm469_vm0, %v2279_v61  ;;  %v2198_v61 = vor.u32 %v2311_v58, %v2197_v56 }
  0x5a   : > { %1085 = vmatpush.bf16.msrb.mxu3 %v2198_v61  ;;  %2340 = vmatpush.bf16.msra.mxu2 %v2146_v51 }
  0x5e   : > { %1086 = vmatpush.bf16.msrb.mxu3 %v2190_v2  ;;  %2341 = vmatpush.bf16.msra.mxu2 %v2138_v5 }
  0x65   : > { %2095 = vmatmul.msk.bf16.gmra.mxu0 %vm469_vm0, %v2272_v24  ;;  %2104 = vmatmul.msk.bf16.gmra.mxu2 %vm469_vm0, %v2281_v25 }
  0x66   : > { %2111 = vmatmul.msk.bf16.gmra.mxu1 %vm469_vm0, %v2272_v24 }
  0x68   : > { %2119 = vmatmul.msk.bf16.gmra.mxu3 %vm469_vm0, %v2280_v11  ;;  %v2130_v11 = vor.u32 %v2292_v7, %v2127_v9 }
  0x6a   : > { %1175 = vmatpush.bf16.msrb.mxu0 %v2130_v11  ;;  %2342 = vmatpush.bf16.msra.mxu2 %v2130_v11 }
  0x75   : > { %2096 = vmatmul.msk.bf16.gmra.mxu0 %vm469_vm0, %v2273_v40  ;;  %2105 = vmatmul.msk.bf16.gmra.mxu2 %vm469_vm0, %v2282_v41 }
  0x76   : > { %2112 = vmatmul.msk.bf16.gmra.mxu1 %vm469_vm0, %v2273_v40 }
  0x78   : > { %2120 = vmatmul.msk.bf16.gmra.mxu3 %vm469_vm0, %v2281_v25 }
  0x85   : > { %2097 = vmatmul.msk.bf16.gmra.mxu0 %vm469_vm0, %v2274_v52  ;;  %2106 = vmatmul.msk.bf16.gmra.mxu2 %vm469_vm0, %v2283_v53 }
  0x86   : > { %2113 = vmatmul.msk.bf16.gmra.mxu1 %vm469_vm0, %v2274_v52 }
  0x88   : > { %2121 = vmatmul.msk.bf16.gmra.mxu3 %vm469_vm0, %v2282_v41 }
  0x95   : > { %2098 = vmatmul.msk.bf16.gmra.mxu0 %vm469_vm0, %v2275_v10 }
  0x96   : > { %2114 = vmatmul.msk.bf16.gmra.mxu1 %vm469_vm0, %v2275_v10 }
  0x98   : > { %2122 = vmatmul.msk.bf16.gmra.mxu3 %vm469_vm0, %v2283_v53 }
  0xa2   : > { %v527_v12 = vpop.f32.mrf.mxu0 }
  0xa3   : > { %v616_v13 = vpop.f32.mrf.mxu1  ;;  %v528_v16 = vadd.f32 %v527_v12, %v2917_v14 }
  0xa4   : > { %v617_v15 = vadd.f32 %v616_v13, %v2915_v8 }
  0xa5   : > { %2099 = vmatmul.msk.bf16.gmra.mxu0 %vm469_vm0, %v2665_v33  ;;  %v696_v24 = vmax.f32 %v528_v16, 0.0 }
  0xa6   : > { %v697_v22 = vmax.f32 %v617_v15, 0.0 }
  0xa8   : > { %v2923_v19 = vpop.f32.mrf.mxu2 }
  0xaa   : > { %v529_v18 = vpop.f32.mrf.mxu0 }
  0xab   : > { %v656_v17 = vpop.f32.mrf.mxu3  ;;  %v530_v20 = vadd.f32 %v529_v18, %v2917_v14  ;;  %v618_v21 = vpop.f32.mrf.mxu1 }
  0xac   : > { %v619_v23 = vadd.f32 %v618_v21, %v2915_v8  ;;  %v657_v33 = vadd.f32 %v656_v17, %v2915_v8 }
  0xad   : > { %v698_v25 = vmax.f32 %v530_v20, 0.0 }
  0xae   : > { %v699_v26 = vmax.f32 %v619_v23, 0.0  ;;  %v729_v31 = vmax.f32 %v657_v33, 0.0 }
  0xaf   : > { %v760_v27 = vpack.c.bf16 %v698_v25, %v696_v24 }
  0xb0   : > { %v761_v28 = vpack.c.bf16 %v699_v26, %v697_v22  ;;  %v2929_v37 = vpop.f32.mrf.mxu2 }
  0xb1   : > { %998 = vmatmul.bf16.vlgmr.msrb.gmra.mxu2 %v760_v27 }
  0xb2   : > { %1087 = vmatmul.bf16.vlgmr.msrb.gmra.mxu3 %v761_v28  ;;  %1265 = vmatmul.bf16.vlgmr.msrb.gmra.mxu1 %v761_v28  ;;  %v532_v30 = vpop.f32.mrf.mxu0 }
  0xb3   : > { %v658_v29 = vpop.f32.mrf.mxu3  ;;  %v621_v34 = vpop.f32.mrf.mxu1  ;;  %v533_v40 = vadd.f32 %v532_v30, %v2917_v14 }
  0xb4   : > { %v659_v32 = vadd.f32 %v658_v29, %v2915_v8  ;;  %v622_v39 = vadd.f32 %v621_v34, %v2915_v8 }
  0xb5   : > { %1176 = vmatmul.bf16.vlgmr.msrb.gmra.mxu0 %v760_v27  ;;  %v700_v47 = vmax.f32 %v533_v40, 0.0 }
  0xb6   : > { %v731_v35 = vmax.f32 %v659_v32, 0.0  ;;  %v701_v45 = vmax.f32 %v622_v39, 0.0 }
  0xb8   : > { %v2931_v38 = vpack.c.bf16 %v731_v35, %v729_v31  ;;  %v2938_v52 = vpop.f32.mrf.mxu2 }
  0xba   : > { %v534_v42 = vpop.f32.mrf.mxu0 }
  0xbb   : > { %v661_v41 = vpop.f32.mrf.mxu3  ;;  %v535_v43 = vadd.f32 %v534_v42, %v2917_v14  ;;  %v623_v44 = vpop.f32.mrf.mxu1 }
  0xbc   : > { %v624_v46 = vadd.f32 %v623_v44, %v2915_v8  ;;  %v662_v51 = vadd.f32 %v661_v41, %v2915_v8 }
  0xbd   : > { %v702_v48 = vmax.f32 %v535_v43, 0.0 }
  0xbe   : > { %v703_v49 = vmax.f32 %v624_v46, 0.0  ;;  %v733_v57 = vmax.f32 %v662_v51, 0.0 }
  0xbf   : > { %v762_v53 = vpack.c.bf16 %v702_v48, %v700_v47 }
  0xc0   : > { %v763_v54 = vpack.c.bf16 %v703_v49, %v701_v45  ;;  %v2944_v63 = vpop.f32.mrf.mxu2 }
  0xc1   : > { %1003 = vmatmul.bf16.gmra.mxu2 %v762_v53 }
  0xc2   : > { %1092 = vmatmul.bf16.gmra.mxu3 %v763_v54  ;;  %1270 = vmatmul.bf16.gmra.mxu1 %v763_v54  ;;  %v537_v56 = vpop.f32.mrf.mxu0 }
  0xc3   : > { %v663_v55 = vpop.f32.mrf.mxu3  ;;  %v626_v59 = vpop.f32.mrf.mxu1  ;;  %v538_v0 = vadd.f32 %v537_v56, %v2917_v14 }
  0xc4   : > { %v664_v58 = vadd.f32 %v663_v55, %v2915_v8  ;;  %v627_v62 = vadd.f32 %v626_v59, %v2915_v8 }
  0xc5   : > { %1181 = vmatmul.bf16.gmra.mxu0 %v762_v53  ;;  %v704_v6 = vmax.f32 %v538_v0, 0.0 }
  0xc6   : > { %v735_v60 = vmax.f32 %v664_v58, 0.0  ;;  %v705_v4 = vmax.f32 %v627_v62, 0.0 }
  0xc8   : > { %v2941_v61 = vpack.c.bf16 %v735_v60, %v733_v57  ;;  %v2950_v16 = vpop.f32.mrf.mxu2 }
  0xca   : > { %v539_v2 = vpop.f32.mrf.mxu0 }
  0xcb   : > { %v666_v1 = vpop.f32.mrf.mxu3  ;;  %v540_v3 = vadd.f32 %v539_v2, %v2917_v14  ;;  %v628_v36 = vpop.f32.mrf.mxu1 }
  0xcc   : > { %v629_v5 = vadd.f32 %v628_v36, %v2915_v8  ;;  %v667_v10 = vadd.f32 %v666_v1, %v2915_v8 }
  0xcd   : > { %v706_v7 = vmax.f32 %v540_v3, 0.0 }
  0xce   : > { %v707_v9 = vmax.f32 %v629_v5, 0.0  ;;  %v737_v15 = vmax.f32 %v667_v10, 0.0 }
  0xcf   : > { %v764_v11 = vpack.c.bf16 %v706_v7, %v704_v6 }
  0xd0   : > { %v765_v50 = vpack.c.bf16 %v707_v9, %v705_v4  ;;  %v2959_v29 = vpop.f32.mrf.mxu2 }
  0xd1   : > { %1008 = vmatmul.bf16.gmra.mxu2 %v764_v11 }
  0xd2   : > { %1097 = vmatmul.bf16.gmra.mxu3 %v765_v50  ;;  %1275 = vmatmul.bf16.gmra.mxu1 %v765_v50  ;;  %v542_v13 = vpop.f32.mrf.mxu0 }
  0xd3   : > { %v668_v12 = vpop.f32.mrf.mxu3  ;;  %v631_v18 = vpop.f32.mrf.mxu1  ;;  %v543_v23 = vadd.f32 %v542_v13, %v2917_v14 }
  0xd4   : > { %v669_v17 = vadd.f32 %v668_v12, %v2915_v8  ;;  %v632_v22 = vadd.f32 %v631_v18, %v2915_v8 }
  0xd5   : > { %1186 = vmatmul.bf16.gmra.mxu0 %v764_v11  ;;  %v708_v30 = vmax.f32 %v543_v23, 0.0 }
  0xd6   : > { %v739_v20 = vmax.f32 %v669_v17, 0.0  ;;  %v709_v27 = vmax.f32 %v632_v22, 0.0 }
  0xd8   : > { %v2953_v21 = vpack.c.bf16 %v739_v20, %v737_v15  ;;  %v2963_v46 = vpop.f32.mrf.mxu2 }
  0xda   : > { %v544_v25 = vpop.f32.mrf.mxu0 }
  0xdb   : > { %v671_v24 = vpop.f32.mrf.mxu3  ;;  %v545_v26 = vadd.f32 %v544_v25, %v2917_v14  ;;  %v633_v33 = vpop.f32.mrf.mxu1 }
  0xdc   : > { %v634_v28 = vadd.f32 %v633_v33, %v2915_v8  ;;  %v672_v34 = vadd.f32 %v671_v24, %v2915_v8 }
  0xdd   : > { %v710_v31 = vmax.f32 %v545_v26, 0.0 }
  0xde   : > { %v711_v32 = vmax.f32 %v634_v28, 0.0  ;;  %v741_v42 = vmax.f32 %v672_v34, 0.0 }
  0xdf   : > { %v766_v35 = vpack.c.bf16 %v710_v31, %v708_v30 }
  0xe0   : > { %v767_v39 = vpack.c.bf16 %v711_v32, %v709_v27  ;;  %v2972_v2 = vpop.f32.mrf.mxu2 }
  0xe1   : > { %1013 = vmatmul.bf16.gmra.mxu2 %v766_v35 }
  0xe2   : > { %1102 = vmatmul.bf16.gmra.mxu3 %v767_v39  ;;  %1280 = vmatmul.bf16.gmra.mxu1 %v767_v39  ;;  %v547_v41 = vpop.f32.mrf.mxu0 }
  0xe3   : > { %v673_v40 = vpop.f32.mrf.mxu3  ;;  %v636_v44 = vpop.f32.mrf.mxu1  ;;  %v548_v49 = vadd.f32 %v547_v41, %v2917_v14 }
  0xe4   : > { %v674_v43 = vadd.f32 %v673_v40, %v2915_v8  ;;  %v637_v48 = vadd.f32 %v636_v44, %v2915_v8 }
  0xe5   : > { %1191 = vmatmul.bf16.gmra.mxu0 %v766_v35  ;;  %v712_v58 = vmax.f32 %v548_v49, 0.0 }
  0xe6   : > { %v743_v45 = vmax.f32 %v674_v43, 0.0  ;;  %v713_v56 = vmax.f32 %v637_v48, 0.0 }
  0xe8   : > { %v2965_v47 = vpack.c.bf16 %v743_v45, %v741_v42  ;;  %v2979_v13 = vpop.f32.mrf.mxu2 }
  0xea   : > { %v549_v53 = vpop.f32.mrf.mxu0 }
  0xeb   : > { %v676_v51 = vpop.f32.mrf.mxu3  ;;  %v550_v54 = vadd.f32 %v549_v53, %v2917_v14  ;;  %v638_v55 = vpop.f32.mrf.mxu1 }
  0xec   : > { %v639_v57 = vadd.f32 %v638_v55, %v2915_v8  ;;  %v677_v62 = vadd.f32 %v676_v51, %v2915_v8 }
  0xed   : > { %v714_v59 = vmax.f32 %v550_v54, 0.0 }
  0xee   : > { %v715_v60 = vmax.f32 %v639_v57, 0.0  ;;  %v745_v4 = vmax.f32 %v677_v62, 0.0 }
  0xef   : > { %v768_v0 = vpack.c.bf16 %v714_v59, %v712_v58 }
  0xf0   : > { %v769_v1 = vpack.c.bf16 %v715_v60, %v713_v56  ;;  %v2985_v34 = vpop.f32.mrf.mxu2 }
  0xf1   : > { %1018 = vmatmul.bf16.gmra.mxu2 %v768_v0 }
  0xf2   : > { %1107 = vmatmul.bf16.gmra.mxu3 %v769_v1  ;;  %1285 = vmatmul.bf16.gmra.mxu1 %v769_v1  ;;  %v552_v36 = vpop.f32.mrf.mxu0 }
  0xf3   : > { %v678_v3 = vpop.f32.mrf.mxu3  ;;  %v641_v6 = vpop.f32.mrf.mxu1  ;;  %v553_v11 = vadd.f32 %v552_v36, %v2917_v14 }
  0xf4   : > { %v679_v5 = vadd.f32 %v678_v3, %v2915_v8  ;;  %v642_v10 = vadd.f32 %v641_v6, %v2915_v8 }
  0xf5   : > { %1196 = vmatmul.bf16.gmra.mxu0 %v768_v0  ;;  %v716_v22 = vmax.f32 %v553_v11, 0.0 }
  0xf6   : > { %v747_v7 = vmax.f32 %v679_v5, 0.0  ;;  %v717_v18 = vmax.f32 %v642_v10, 0.0 }
  0xf8   : > { %v2975_v9 = vpack.c.bf16 %v747_v7, %v745_v4  ;;  %v2993_v55 = vpop.f32.mrf.mxu2 }
  0xfa   : > { %v554_v12 = vpop.f32.mrf.mxu0 }
  0xfb   : > { %v681_v50 = vpop.f32.mrf.mxu3  ;;  %v555_v15 = vadd.f32 %v554_v12, %v2917_v14  ;;  %v643_v17 = vpop.f32.mrf.mxu1 }
  0xfc   : > { %v644_v20 = vadd.f32 %v643_v17, %v2915_v8  ;;  %v682_v25 = vadd.f32 %v681_v50, %v2915_v8 }
  0xfd   : > { %v718_v23 = vmax.f32 %v555_v15, 0.0 }
  0xfe   : > { %v719_v24 = vmax.f32 %v644_v20, 0.0  ;;  %v749_v30 = vmax.f32 %v682_v25, 0.0 }
  0xff   : > { %v770_v26 = vpack.c.bf16 %v718_v23, %v716_v22 }
 0x100   : > { %v771_v33 = vpack.c.bf16 %v719_v24, %v717_v18  ;;  %v3000_v5 = vpop.f32.mrf.mxu2 }
 0x101   : > { %1023 = vmatmul.bf16.gmra.mxu2 %v770_v26 }
 0x102   : > { %1112 = vmatmul.bf16.gmra.mxu3 %v771_v33  ;;  %1290 = vmatmul.bf16.gmra.mxu1 %v771_v33  ;;  %v557_v28 = vpop.f32.mrf.mxu0 }
 0x103   : > { %v683_v27 = vpop.f32.mrf.mxu3  ;;  %v646_v32 = vpop.f32.mrf.mxu1  ;;  %v558_v41 = vadd.f32 %v557_v28, %v2917_v14 }
 0x104   : > { %v684_v31 = vadd.f32 %v683_v27, %v2915_v8  ;;  %v647_v40 = vadd.f32 %v646_v32, %v2915_v8 }
 0x105   : > { %1201 = vmatmul.bf16.gmra.mxu0 %v770_v26  ;;  %v720_v51 = vmax.f32 %v558_v41, 0.0 }
 0x106   : > { %v751_v35 = vmax.f32 %v684_v31, 0.0  ;;  %v721_v48 = vmax.f32 %v647_v40, 0.0 }
 0x108   : > { %v2987_v39 = vpack.c.bf16 %v751_v35, %v749_v30  ;;  %v3006_v26 = vpop.f32.mrf.mxu2 }
 0x10a   : > { %v559_v43 = vpop.f32.mrf.mxu0 }
 0x10b   : > { %v686_v42 = vpop.f32.mrf.mxu3  ;;  %v560_v44 = vadd.f32 %v559_v43, %v2917_v14  ;;  %v648_v45 = vpop.f32.mrf.mxu1  ;;  %v1410_v43 = vld [vmem:[%s3449_s5] sm:$0x3] }
 0x10c   : > { %v649_v49 = vadd.f32 %v648_v45, %v2915_v8  ;;  %v687_v56 = vadd.f32 %v686_v42, %v2915_v8  ;;  %v824_v42 = vld [vmem:[%s3448_s4] sm:$0x3] }
 0x10d   : > { %v722_v53 = vmax.f32 %v560_v44, 0.0 }
 0x10e   : > { %v723_v54 = vmax.f32 %v649_v49, 0.0  ;;  %v753_v62 = vmax.f32 %v687_v56, 0.0  ;;  %v3021_v49 = vperm.slane %v824_v42, 1 }
 0x10f   : > { %v772_v57 = vpack.c.bf16 %v722_v53, %v720_v51  ;;  %v1411_v51 = vunpack.c.l.bf16 %v1410_v43  ;;  %v3023_v53 = vperm.slane %v824_v42, 0 }
 0x110   : > { %v773_v58 = vpack.c.bf16 %v723_v54, %v721_v48  ;;  %v3013_v41 = vpop.f32.mrf.mxu2 }
 0x111   : > { %1028 = vmatmul.bf16.gmra.mxu2 %v772_v57 }
 0x112   : > { %1117 = vmatmul.bf16.gmra.mxu3 %v773_v58  ;;  %1295 = vmatmul.bf16.gmra.mxu1 %v773_v58  ;;  %v562_v60 = vpop.f32.mrf.mxu0  ;;  %v1414_v58 = vperm.slane %v1411_v51, 2 }
 0x113   : > { %v688_v59 = vpop.f32.mrf.mxu3  ;;  %v651_v1 = vpop.f32.mrf.mxu1  ;;  %v563_v6 = vadd.f32 %v562_v60, %v2917_v14 }
 0x114   : > { %v689_v0 = vadd.f32 %v688_v59, %v2915_v8  ;;  %v652_v4 = vadd.f32 %v651_v1, %v2915_v8  ;;  %v573_v1 = vadd.f32 %v2923_v19, %v2917_v14 }
 0x115   : > { %1206 = vmatmul.bf16.gmra.mxu0 %v772_v57  ;;  %v724_v17 = vmax.f32 %v563_v6, 0.0  ;;  %v1413_v57 = vperm.slane %v1411_v51, 0  ;;  %v578_v51 = vadd.f32 %v2938_v52, %v2917_v14 }
 0x116   : > { %v755_v3 = vmax.f32 %v689_v0, 0.0  ;;  %v725_v12 = vmax.f32 %v652_v4, 0.0 }
 0x118   : > { %v2997_v36 = vpack.c.bf16 %v755_v3, %v753_v62  ;;  %v575_v3 = vadd.f32 %v2929_v37, %v2917_v14 }
 0x11a   : > { %v564_v10 = vpop.f32.mrf.mxu0 }
 0x11b   : > { %v691_v7 = vpop.f32.mrf.mxu3  ;;  %v565_v11 = vadd.f32 %v564_v10, %v2917_v14  ;;  %v653_v50 = vpop.f32.mrf.mxu1  ;;  %v3035_v10 = vperm.slane %v1414_v58, 0 }
 0x11c   : > { %v654_v15 = vadd.f32 %v653_v50, %v2915_v8  ;;  %v692_v22 = vadd.f32 %v691_v7, %v2915_v8  ;;  %v3033_v7 = vperm.slane %v1413_v57, 0  ;;  %v732_v50 = vmax.f32 %v573_v1, 0.0 }
 0x11d   : > { %v726_v18 = vmax.f32 %v565_v11, 0.0 }
 0x11e   : > { %v727_v20 = vmax.f32 %v654_v15, 0.0  ;;  %v757_v27 = vmax.f32 %v692_v22, 0.0  ;;  %v734_v15 = vmax.f32 %v575_v3, 0.0 }
 0x11f   : > { %v774_v23 = vpack.c.bf16 %v726_v18, %v724_v17 }
 0x120   : > { %v775_v24 = vpack.c.bf16 %v727_v20, %v725_v12 }
 0x121   : > { %1033 = vmatmul.bf16.gmra.mxu2 %v774_v23 }
 0x122   : > { %1122 = vmatmul.bf16.gmra.mxu3 %v775_v24  ;;  %1300 = vmatmul.bf16.gmra.mxu1 %v775_v24  ;;  %v567_v33 = vpop.f32.mrf.mxu0 }
 0x123   : > { %v693_v25 = vpop.f32.mrf.mxu3  ;;  %v568_v32 = vadd.f32 %v567_v33, %v2917_v14 }
 0x124   : > { %v694_v28 = vadd.f32 %v693_v25, %v2915_v8 }
 0x125   : > { %1211 = vmatmul.bf16.gmra.mxu0 %v774_v23  ;;  %v728_v8 = vmax.f32 %v568_v32, 0.0 }
 0x126   : > { %v759_v30 = vmax.f32 %v694_v28, 0.0  ;;  %v778_v28 = vpack.c.bf16 %v734_v15, %v732_v50 }
 0x128   : > { %v3009_v31 = vpack.c.bf16 %v759_v30, %v757_v27 }
 0x12a   : > { %v569_v35 = vpop.f32.mrf.mxu0 }
 0x12b   : > { %v570_v40 = vadd.f32 %v569_v35, %v2917_v14 }
 0x12d   : > { %v730_v44 = vmax.f32 %v570_v40, 0.0 }
 0x12f   : > { %v1266_v45 = vpop.f32.mrf.mxu1  ;;  %v776_v48 = vpack.c.bf16 %v730_v44, %v728_v8 }
 0x131   : > { %1038 = vmatmul.bf16.gmra.mxu2 %v776_v48 }
 0x132   : > { %1127 = vmatmul.bf16.gmra.mxu3 %v2931_v38  ;;  %1305 = vmatmul.bf16.gmra.mxu1 %v2931_v38  ;;  %v1177_v54 = vpop.f32.mrf.mxu0 }
 0x133   : > { %v1178_v56 = vadd.f32 %v1177_v54, %v3021_v49 }
 0x134   : > { %v999_v59 = vpop.f32.mrf.mxu2 }
 0x135   : > { %v1267_v60 = vadd.f32 %v1266_v45, %v1178_v56  ;;  %v1000_v62 = vadd.f32 %v999_v59, %v3023_v53  ;;  %v1088_v0 = vpop.f32.mrf.mxu3  ;;  %1216 = vmatmul.bf16.gmra.mxu0 %v776_v48  ;;  %v736_v59 = vmax.f32 %v578_v51, 0.0 }
 0x137   : > { %v1347_v4 = vmax.f32 %v1267_v60, 0.0  ;;  %v1089_v6 = vadd.f32 %v1088_v0, %v1000_v62  ;;  %v1268_v38 = vpop.f32.mrf.mxu1 }
 0x139   : > { %v1346_v11 = vmax.f32 %v1089_v6, 0.0  ;;  %v1420_v19 = vmul.f32 %v3035_v10, %v1347_v4 }
 0x13a   : > { %v1179_v12 = vpop.f32.mrf.mxu0 }
 0x13b   : > { %v1180_v17 = vadd.f32 %v1179_v12, %v3021_v49  ;;  %v1419_v18 = vmul.f32 %v3033_v7, %v1346_v11 }
 0x13c   : > { %v1001_v20 = vpop.f32.mrf.mxu2 }
 0x13d   : > { %v1269_v22 = vadd.f32 %v1268_v38, %v1180_v17  ;;  %v1002_v37 = vadd.f32 %v1001_v20, %v3023_v53  ;;  %v1090_v23 = vpop.f32.mrf.mxu3  ;;  %v1483_v24 = vadd.f32 %v1420_v19, %v1419_v18 }
 0x13f   : > { %v1349_v25 = vmax.f32 %v1269_v22, 0.0  ;;  %v1091_v33 = vadd.f32 %v1090_v23, %v1002_v37  ;;  %v1271_v27 = vpop.f32.mrf.mxu1  ;;  %1484 = vadd.xlane.f32.xlu0 %v1483_v24 }
 0x141   : > { %v1348_v30 = vmax.f32 %v1091_v33, 0.0  ;;  %1043 = vmatmul.bf16.gmra.mxu2 %v778_v28  ;;  %v1422_v42 = vmul.f32 %v3035_v10, %v1349_v25 }
 0x142   : > { %1132 = vmatmul.bf16.gmra.mxu3 %v2941_v61  ;;  %1310 = vmatmul.bf16.gmra.mxu1 %v2941_v61  ;;  %v1182_v32 = vpop.f32.mrf.mxu0  ;;  %v580_v61 = vadd.f32 %v2944_v63, %v2917_v14 }
 0x143   : > { %v1183_v35 = vadd.f32 %v1182_v32, %v3021_v49  ;;  %v1421_v40 = vmul.f32 %v3033_v7, %v1348_v30 }
 0x144   : > { %v1004_v43 = vpop.f32.mrf.mxu2  ;;  %v738_v62 = vmax.f32 %v580_v61, 0.0 }
 0x145   : > { %v1272_v8 = vadd.f32 %v1271_v27, %v1183_v35  ;;  %v1005_v44 = vadd.f32 %v1004_v43, %v3023_v53  ;;  %v1093_v45 = vpop.f32.mrf.mxu3  ;;  %1221 = vmatmul.bf16.gmra.mxu0 %v778_v28  ;;  %v1486_v48 = vadd.f32 %v1422_v42, %v1421_v40  ;;  %v583_v27 = vadd.f32 %v2950_v16, %v2917_v14 }
 0x146   : > { %v780_v15 = vpack.c.bf16 %v738_v62, %v736_v59 }
 0x147   : > { %v1351_v54 = vmax.f32 %v1272_v8, 0.0  ;;  %v1094_v56 = vadd.f32 %v1093_v45, %v1005_v44  ;;  %v1273_v57 = vpop.f32.mrf.mxu1  ;;  %1487 = vadd.xlane.f32.xlu0 %v1486_v48  ;;  %v740_v40 = vmax.f32 %v583_v27, 0.0 }
 0x149   : > { %v1350_v58 = vmax.f32 %v1094_v56, 0.0  ;;  %v1424_v3 = vmul.f32 %v3035_v10, %v1351_v54 }
 0x14a   : > { %v1184_v60 = vpop.f32.mrf.mxu0 }
 0x14b   : > { %v1185_v0 = vadd.f32 %v1184_v60, %v3021_v49  ;;  %v1423_v1 = vmul.f32 %v3033_v7, %v1350_v58 }
 0x14c   : > { %v1006_v4 = vpop.f32.mrf.mxu2 }
 0x14d   : > { %v1274_v6 = vadd.f32 %v1273_v57, %v1185_v0  ;;  %v1007_v52 = vadd.f32 %v1006_v4, %v3023_v53  ;;  %v1095_v38 = vpop.f32.mrf.mxu3  ;;  %v1489_v63 = vadd.f32 %v1424_v3, %v1423_v1 }
 0x14f   : > { %v1353_v11 = vmax.f32 %v1274_v6, 0.0  ;;  %v1096_v50 = vadd.f32 %v1095_v38, %v1007_v52  ;;  %v1276_v12 = vpop.f32.mrf.mxu1  ;;  %1490 = vadd.xlane.f32.xlu1 %v1489_v63  ;;  %v588_v63 = vadd.f32 %v2963_v46, %v2917_v14 }
 0x151   : > { %v1352_v17 = vmax.f32 %v1096_v50, 0.0  ;;  %1048 = vmatmul.bf16.gmra.mxu2 %v780_v15  ;;  %v1426_v22 = vmul.f32 %v3035_v10, %v1353_v11 }
 0x152   : > { %1137 = vmatmul.bf16.gmra.mxu3 %v2953_v21  ;;  %1315 = vmatmul.bf16.gmra.mxu1 %v2953_v21  ;;  %v1187_v18 = vpop.f32.mrf.mxu0  ;;  %v585_v21 = vadd.f32 %v2959_v29, %v2917_v14 }
 0x153   : > { %v1188_v19 = vadd.f32 %v1187_v18, %v3021_v49  ;;  %v1425_v20 = vmul.f32 %v3033_v7, %v1352_v17  ;;  %v744_v17 = vmax.f32 %v588_v63, 0.0 }
 0x154   : > { %v1009_v37 = vpop.f32.mrf.mxu2  ;;  %v742_v43 = vmax.f32 %v585_v21, 0.0 }
 0x155   : > { %v1277_v23 = vadd.f32 %v1276_v12, %v1188_v19  ;;  %v1010_v24 = vadd.f32 %v1009_v37, %v3023_v53  ;;  %v1098_v25 = vpop.f32.mrf.mxu3  ;;  %1226 = vmatmul.bf16.gmra.mxu0 %v780_v15  ;;  %v1492_v33 = vadd.f32 %v1426_v22, %v1425_v20 }
 0x156   : > { %v782_v58 = vpack.c.bf16 %v742_v43, %v740_v40 }
 0x157   : > { %v1355_v28 = vmax.f32 %v1277_v23, 0.0  ;;  %v1099_v30 = vadd.f32 %v1098_v25, %v1010_v24  ;;  %v1278_v32 = vpop.f32.mrf.mxu1  ;;  %1493 = vadd.xlane.f32.xlu1 %v1492_v33 }
 0x159   : > { %v1354_v35 = vmax.f32 %v1099_v30, 0.0  ;;  %v1428_v45 = vmul.f32 %v3035_v10, %v1355_v28 }
 0x15a   : > { %v1189_v42 = vpop.f32.mrf.mxu0 }
 0x15b   : > { %v1190_v8 = vadd.f32 %v1189_v42, %v3021_v49  ;;  %v1427_v44 = vmul.f32 %v3033_v7, %v1354_v35 }
 0x15c   : > { %v1011_v48 = vpop.f32.mrf.mxu2 }
 0x15d   : > { %v1279_v51 = vadd.f32 %v1278_v32, %v1190_v8  ;;  %v1012_v16 = vadd.f32 %v1011_v48, %v3023_v53  ;;  %v1100_v61 = vpop.f32.mrf.mxu3  ;;  %v1495_v29 = vadd.f32 %v1428_v45, %v1427_v44 }
 0x15f   : > { %v1357_v54 = vmax.f32 %v1279_v51, 0.0  ;;  %v1101_v56 = vadd.f32 %v1100_v61, %v1012_v16  ;;  %v1281_v57 = vpop.f32.mrf.mxu1  ;;  %1496 = vadd.xlane.f32.xlu2 %v1495_v29  ;;  %v593_v51 = vadd.f32 %v2979_v13, %v2917_v14 }
 0x161   : > { %v1356_v59 = vmax.f32 %v1101_v56, 0.0  ;;  %1053 = vmatmul.bf16.gmra.mxu2 %v782_v58  ;;  %v1430_v1 = vmul.f32 %v3035_v10, %v1357_v54  ;;  %v748_v56 = vmax.f32 %v593_v51, 0.0 }
 0x162   : > { %1142 = vmatmul.bf16.gmra.mxu3 %v2965_v47  ;;  %1320 = vmatmul.bf16.gmra.mxu1 %v2965_v47  ;;  %v1192_v60 = vpop.f32.mrf.mxu0  ;;  %v590_v47 = vadd.f32 %v2972_v2, %v2917_v14 }
 0x163   : > { %v1193_v62 = vadd.f32 %v1192_v60, %v3021_v49  ;;  %v1429_v0 = vmul.f32 %v3033_v7, %v1356_v59 }
 0x164   : > { %v1014_v3 = vpop.f32.mrf.mxu2  ;;  %v746_v19 = vmax.f32 %v590_v47, 0.0 }
 0x165   : > { %v1282_v4 = vadd.f32 %v1281_v57, %v1193_v62  ;;  %v1015_v6 = vadd.f32 %v1014_v3, %v3023_v53  ;;  %v1103_v52 = vpop.f32.mrf.mxu3  ;;  %1231 = vmatmul.bf16.gmra.mxu0 %v782_v58  ;;  %v1498_v38 = vadd.f32 %v1430_v1, %v1429_v0 }
 0x166   : > { %v784_v28 = vpack.c.bf16 %v746_v19, %v744_v17 }
 0x167   : > { %v1359_v11 = vmax.f32 %v1282_v4, 0.0  ;;  %v1104_v50 = vadd.f32 %v1103_v52, %v1015_v6  ;;  %v1283_v12 = vpop.f32.mrf.mxu1  ;;  %1499 = vadd.xlane.f32.xlu2 %v1498_v38 }
 0x169   : > { %v1358_v15 = vmax.f32 %v1104_v50, 0.0  ;;  %v1432_v37 = vmul.f32 %v3035_v10, %v1359_v11 }
 0x16a   : > { %v1194_v18 = vpop.f32.mrf.mxu0 }
 0x16b   : > { %v1431_v20 = vmul.f32 %v3033_v7, %v1358_v15  ;;  %v1195_v22 = vadd.f32 %v1194_v18, %v3021_v49 }
 0x16c   : > { %v1016_v23 = vpop.f32.mrf.mxu2 }
 0x16d   : > { %v1284_v24 = vadd.f32 %v1283_v12, %v1195_v22  ;;  %v1017_v46 = vadd.f32 %v1016_v23, %v3023_v53  ;;  %v1105_v25 = vpop.f32.mrf.mxu3  ;;  %v1501_v2 = vadd.f32 %v1432_v37, %v1431_v20  ;;  %v598_v22 = vadd.f32 %v2993_v55, %v2917_v14 }
 0x16f   : > { %v1361_v33 = vmax.f32 %v1284_v24, 0.0  ;;  %v1106_v27 = vadd.f32 %v1105_v25, %v1017_v46  ;;  %v1286_v21 = vpop.f32.mrf.mxu1  ;;  %1502 = vadd.xlane.f32.xlu0 %v1501_v2  ;;  %v752_v25 = vmax.f32 %v598_v22, 0.0 }
 0x171   : > { %v1360_v30 = vmax.f32 %v1106_v27, 0.0  ;;  %1058 = vmatmul.bf16.gmra.mxu2 %v784_v28  ;;  %v1434_v42 = vmul.f32 %v3035_v10, %v1361_v33 }
 0x172   : > { %1147 = vmatmul.bf16.gmra.mxu3 %v2975_v9  ;;  %1325 = vmatmul.bf16.gmra.mxu1 %v2975_v9  ;;  %v1197_v32 = vpop.f32.mrf.mxu0  ;;  %v595_v9 = vadd.f32 %v2985_v34, %v2917_v14 }
 0x173   : > { %v1198_v35 = vadd.f32 %v1197_v32, %v3021_v49  ;;  %v1433_v40 = vmul.f32 %v3033_v7, %v1360_v30 }
 0x174   : > { %v1019_v43 = vpop.f32.mrf.mxu2  ;;  %v750_v58 = vmax.f32 %v595_v9, 0.0 }
 0x175   : > { %v1287_v8 = vadd.f32 %v1286_v21, %v1198_v35  ;;  %v1020_v44 = vadd.f32 %v1019_v43, %v3023_v53  ;;  %v1108_v45 = vpop.f32.mrf.mxu3  ;;  %1236 = vmatmul.bf16.gmra.mxu0 %v784_v28  ;;  %v1504_v48 = vadd.f32 %v1434_v42, %v1433_v40 }
 0x176   : > { %v786_v38 = vpack.c.bf16 %v750_v58, %v748_v56 }
 0x177   : > { %v1363_v16 = vmax.f32 %v1287_v8, 0.0  ;;  %v1109_v61 = vadd.f32 %v1108_v45, %v1020_v44  ;;  %v1288_v29 = vpop.f32.mrf.mxu1  ;;  %1505 = vadd.xlane.f32.xlu1 %v1504_v48 }
 0x179   : > { %v1362_v54 = vmax.f32 %v1109_v61, 0.0  ;;  %v1436_v62 = vmul.f32 %v3035_v10, %v1363_v16 }
 0x17a   : > { %v1199_v57 = vpop.f32.mrf.mxu0 }
 0x17b   : > { %v1435_v59 = vmul.f32 %v3033_v7, %v1362_v54  ;;  %v1200_v60 = vadd.f32 %v1199_v57, %v3021_v49  ;;  %v603_v57 = vadd.f32 %v3006_v26, %v2917_v14 }
 0x17c   : > { %v1021_v0 = vpop.f32.mrf.mxu2 }
 0x17d   : > { %v1289_v1 = vadd.f32 %v1288_v29, %v1200_v60  ;;  %v1022_v13 = vadd.f32 %v1021_v0, %v3023_v53  ;;  %v1110_v3 = vpop.f32.mrf.mxu3  ;;  %v1507_v34 = vadd.f32 %v1436_v62, %v1435_v59  ;;  %v756_v0 = vmax.f32 %v603_v57, 0.0 }
 0x17f   : > { %v1365_v4 = vmax.f32 %v1289_v1, 0.0  ;;  %v1111_v6 = vadd.f32 %v1110_v3, %v1022_v13  ;;  %v1291_v52 = vpop.f32.mrf.mxu1  ;;  %1508 = vadd.xlane.f32.xlu2 %v1507_v34 }
 0x181   : > { %v1364_v63 = vmax.f32 %v1111_v6, 0.0  ;;  %1063 = vmatmul.bf16.gmra.mxu2 %v786_v38  ;;  %v1438_v12 = vmul.f32 %v3035_v10, %v1365_v4 }
 0x182   : > { %1152 = vmatmul.bf16.gmra.mxu3 %v2987_v39  ;;  %1330 = vmatmul.bf16.gmra.mxu1 %v2987_v39  ;;  %v1202_v47 = vpop.f32.mrf.mxu0  ;;  %v600_v39 = vadd.f32 %v3000_v5, %v2917_v14 }
 0x183   : > { %v1437_v11 = vmul.f32 %v3033_v7, %v1364_v63  ;;  %v1203_v50 = vadd.f32 %v1202_v47, %v3021_v49 }
 0x184   : > { %v1024_v15 = vpop.f32.mrf.mxu2  ;;  %v754_v33 = vmax.f32 %v600_v39, 0.0 }
 0x185   : > { %v1292_v17 = vadd.f32 %v1291_v52, %v1203_v50  ;;  %v1025_v18 = vadd.f32 %v1024_v15, %v3023_v53  ;;  %v1113_v19 = vpop.f32.mrf.mxu3  ;;  %1241 = vmatmul.bf16.gmra.mxu0 %v786_v38  ;;  %v1510_v20 = vadd.f32 %v1438_v12, %v1437_v11 }
 0x186   : > { %v788_v8 = vpack.c.bf16 %v754_v33, %v752_v25 }
 0x187   : > { %v1367_v37 = vmax.f32 %v1292_v17, 0.0  ;;  %v1114_v23 = vadd.f32 %v1113_v19, %v1025_v18  ;;  %v1293_v24 = vpop.f32.mrf.mxu1  ;;  %1511 = vadd.xlane.f32.xlu0 %v1510_v20 }
 0x189   : > { %v1366_v46 = vmax.f32 %v1114_v23, 0.0  ;;  %v1440_v28 = vmul.f32 %v3035_v10, %v1367_v37 }
 0x18a   : > { %v1204_v2 = vpop.f32.mrf.mxu0 }
 0x18b   : > { %v1439_v27 = vmul.f32 %v3033_v7, %v1366_v46  ;;  %v1205_v21 = vadd.f32 %v1204_v2, %v3021_v49 }
 0x18c   : > { %v1026_v30 = vpop.f32.mrf.mxu2 }
 0x18d   : > { %v1294_v32 = vadd.f32 %v1293_v24, %v1205_v21  ;;  %v1027_v55 = vadd.f32 %v1026_v30, %v3023_v53  ;;  %v1115_v35 = vpop.f32.mrf.mxu3  ;;  %v1513_v5 = vadd.f32 %v1440_v28, %v1439_v27 }
 0x18f   : > { %v1369_v40 = vmax.f32 %v1294_v32, 0.0  ;;  %v1116_v42 = vadd.f32 %v1115_v35, %v1027_v55  ;;  %v1296_v43 = vpop.f32.mrf.mxu1  ;;  %1514 = vadd.xlane.f32.xlu1 %v1513_v5 }
 0x191   : > { %v1368_v44 = vmax.f32 %v1116_v42, 0.0  ;;  %1068 = vmatmul.bf16.gmra.mxu2 %v788_v8  ;;  %v1442_v9 = vmul.f32 %v3035_v10, %v1369_v40  ;;  %v3136_v42 = vld [vmem:[#allocation2] ss:$0 sm:$0xff] }
 0x192   : > { %1157 = vmatmul.bf16.gmra.mxu3 %v2997_v36  ;;  %1335 = vmatmul.bf16.gmra.mxu1 %v2997_v36  ;;  %v1207_v45 = vpop.f32.mrf.mxu0  ;;  %v605_v36 = vadd.f32 %v3013_v41, %v2917_v14 }
 0x193   : > { %v1441_v48 = vmul.f32 %v3033_v7, %v1368_v44  ;;  %v1208_v51 = vadd.f32 %v1207_v45, %v3021_v49 }
 0x194   : > { %v1029_v16 = vpop.f32.mrf.mxu2  ;;  %v758_v13 = vmax.f32 %v605_v36, 0.0 }
 0x195   : > { %v1297_v61 = vadd.f32 %v1296_v43, %v1208_v51  ;;  %v1030_v29 = vadd.f32 %v1029_v16, %v3023_v53  ;;  %v1118_v54 = vpop.f32.mrf.mxu3  ;;  %1246 = vmatmul.bf16.gmra.mxu0 %v788_v8  ;;  %v1516_v56 = vadd.f32 %v1442_v9, %v1441_v48 }
 0x196   : > { %v790_v11 = vpack.c.bf16 %v758_v13, %v756_v0 }
 0x197   : > { %v1371_v58 = vmax.f32 %v1297_v61, 0.0  ;;  %v1119_v59 = vadd.f32 %v1118_v54, %v1030_v29  ;;  %v1298_v60 = vpop.f32.mrf.mxu1  ;;  %1517 = vadd.xlane.f32.xlu2 %v1516_v56 }
 0x199   : > { %v1370_v62 = vmax.f32 %v1119_v59, 0.0  ;;  %v1444_v4 = vmul.f32 %v3035_v10, %v1371_v58 }
 0x19a   : > { %v1209_v1 = vpop.f32.mrf.mxu0 }
 0x19b   : > { %v1443_v3 = vmul.f32 %v3033_v7, %v1370_v62  ;;  %v1210_v34 = vadd.f32 %v1209_v1, %v3021_v49 }
 0x19c   : > { %v1031_v6 = vpop.f32.mrf.mxu2 }
 0x19d   : > { %v1299_v52 = vadd.f32 %v1298_v60, %v1210_v34  ;;  %v1032_v26 = vadd.f32 %v1031_v6, %v3023_v53  ;;  %v1120_v38 = vpop.f32.mrf.mxu3  ;;  %v1519_v14 = vadd.f32 %v1444_v4, %v1443_v3 }
 0x19f   : > { %v1373_v41 = vmax.f32 %v1299_v52, 0.0  ;;  %v1121_v63 = vadd.f32 %v1120_v38, %v1032_v26  ;;  %v1301_v47 = vpop.f32.mrf.mxu1  ;;  %1520 = vadd.xlane.f32.xlu0 %v1519_v14 }
 0x1a1   : > { %v1372_v50 = vmax.f32 %v1121_v63, 0.0  ;;  %1073 = vmatmul.bf16.gmra.mxu2 %v790_v11  ;;  %v1446_v18 = vmul.f32 %v3035_v10, %v1373_v41 }
 0x1a2   : > { %1162 = vmatmul.bf16.gmra.mxu3 %v3009_v31  ;;  %1340 = vmatmul.bf16.gmra.mxu1 %v3009_v31  ;;  %v1212_v12 = vpop.f32.mrf.mxu0 }
 0x1a3   : > { %v1445_v15 = vmul.f32 %v3033_v7, %v1372_v50  ;;  %v1213_v17 = vadd.f32 %v1212_v12, %v3021_v49 }
 0x1a4   : > { %v1034_v19 = vpop.f32.mrf.mxu2 }
 0x1a5   : > { %v1302_v20 = vadd.f32 %v1301_v47, %v1213_v17  ;;  %v1035_v22 = vadd.f32 %v1034_v19, %v3023_v53  ;;  %v1123_v39 = vpop.f32.mrf.mxu3  ;;  %v1522_v37 = vadd.f32 %v1446_v18, %v1445_v15 }
 0x1a7   : > { %v1375_v23 = vmax.f32 %v1302_v20, 0.0  ;;  %v1124_v24 = vadd.f32 %v1123_v39, %v1035_v22  ;;  %v1303_v46 = vpop.f32.mrf.mxu1  ;;  %1523 = vadd.xlane.f32.xlu1 %v1522_v37 }
 0x1a9   : > { %v1374_v25 = vmax.f32 %v1124_v24, 0.0  ;;  %v1448_v27 = vmul.f32 %v3035_v10, %v1375_v23 }
 0x1aa   : > { %v1214_v31 = vpop.f32.mrf.mxu0 }
 0x1ab   : > { %v1447_v2 = vmul.f32 %v3033_v7, %v1374_v25  ;;  %v1215_v33 = vadd.f32 %v1214_v31, %v3021_v49 }
 0x1ac   : > { %v1036_v21 = vpop.f32.mrf.mxu2 }
 0x1ad   : > { %v1304_v28 = vadd.f32 %v1303_v46, %v1215_v33  ;;  %v1037_v30 = vadd.f32 %v1036_v21, %v3023_v53  ;;  %v1125_v32 = vpop.f32.mrf.mxu3  ;;  %v1525_v55 = vadd.f32 %v1448_v27, %v1447_v2 }
 0x1af   : > { %v1377_v35 = vmax.f32 %v1304_v28, 0.0  ;;  %v1126_v5 = vadd.f32 %v1125_v32, %v1037_v30  ;;  %v1306_v40 = vpop.f32.mrf.mxu1  ;;  %1526 = vadd.xlane.f32.xlu2 %v1525_v55 }
 0x1b1   : > { %v1376_v43 = vmax.f32 %v1126_v5, 0.0  ;;  %1251 = vmatmul.bf16.vlgmr.msra.gmra.mxu2 %v790_v11  ;;  %v1450_v9 = vmul.f32 %v3035_v10, %v1377_v35 }
 0x1b2   : > { %v1217_v8 = vpop.f32.mrf.mxu0  ;;  %v1485_v44 = vpop.xlane.xlu0 %1484 }
 0x1b3   : > { %v1449_v45 = vmul.f32 %v3033_v7, %v1376_v43  ;;  %v1218_v48 = vadd.f32 %v1217_v8, %v3021_v49  ;;  %v1583_v51 = vadd.f32 %v3136_v42, %v1485_v44 }
 0x1b4   : > { %v1039_v16 = vpop.f32.mrf.mxu2 }
 0x1b5   : > { %v1307_v61 = vadd.f32 %v1306_v40, %v1218_v48  ;;  %1616 = vst.msk [vmem:[%s3142_s26] sm:$0xff] %vm1615_vm1, %v1583_v51  ;;  %v1040_v29 = vadd.f32 %v1039_v16, %v3023_v53  ;;  %v1128_v54 = vpop.f32.mrf.mxu3  ;;  %v1528_v56 = vadd.f32 %v1450_v9, %v1449_v45 }
 0x1b7   : > { %v1379_v57 = vmax.f32 %v1307_v61, 0.0  ;;  %v1129_v36 = vadd.f32 %v1128_v54, %v1040_v29  ;;  %v1308_v58 = vpop.f32.mrf.mxu1  ;;  %1529 = vadd.xlane.f32.xlu0 %v1528_v56 }
 0x1b9   : > { %v1378_v59 = vmax.f32 %v1129_v36, 0.0  ;;  %v1452_v3 = vmul.f32 %v3035_v10, %v1379_v57 }
 0x1ba   : > { %v1219_v60 = vpop.f32.mrf.mxu0  ;;  %v1488_v62 = vpop.xlane.xlu0 %1487 }
 0x1bb   : > { %v1451_v0 = vmul.f32 %v3033_v7, %v1378_v59  ;;  %v1220_v1 = vadd.f32 %v1219_v60, %v3021_v49  ;;  %v1584_v13 = vadd.f32 %v3136_v42, %v1488_v62 }
 0x1bc   : > { %v1041_v34 = vpop.f32.mrf.mxu2 }
 0x1bd   : > { %v1309_v4 = vadd.f32 %v1308_v58, %v1220_v1  ;;  %1617 = vst.msk [vmem:[%s3142_s26 + $0x8] sm:$0xff] %vm1615_vm1, %v1584_v13  ;;  %v1042_v6 = vadd.f32 %v1041_v34, %v3023_v53  ;;  %v1130_v52 = vpop.f32.mrf.mxu3  ;;  %v1531_v26 = vadd.f32 %v1452_v3, %v1451_v0 }
 0x1bf   : > { %v1381_v38 = vmax.f32 %v1309_v4, 0.0  ;;  %v1131_v14 = vadd.f32 %v1130_v52, %v1042_v6  ;;  %v1311_v41 = vpop.f32.mrf.mxu1  ;;  %1532 = vadd.xlane.f32.xlu1 %v1531_v26 }
 0x1c1   : > { %v1380_v63 = vmax.f32 %v1131_v14, 0.0  ;;  %v1454_v17 = vmul.f32 %v3035_v10, %v1381_v38 }
 0x1c2   : > { %v1222_v47 = vpop.f32.mrf.mxu0  ;;  %v1491_v11 = vpop.xlane.xlu1 %1490 }
 0x1c3   : > { %v1453_v50 = vmul.f32 %v3033_v7, %v1380_v63  ;;  %v1223_v12 = vadd.f32 %v1222_v47, %v3021_v49  ;;  %v1585_v15 = vadd.f32 %v3136_v42, %v1491_v11 }
 0x1c4   : > { %v1044_v18 = vpop.f32.mrf.mxu2 }
 0x1c5   : > { %v1312_v19 = vadd.f32 %v1311_v41, %v1223_v12  ;;  %1618 = vst.msk [vmem:[%s3142_s26 + $0x10] sm:$0xff] %vm1615_vm1, %v1585_v15  ;;  %v1045_v20 = vadd.f32 %v1044_v18, %v3023_v53  ;;  %v1133_v22 = vpop.f32.mrf.mxu3  ;;  %v1534_v39 = vadd.f32 %v1454_v17, %v1453_v50 }
 0x1c7   : > { %v1383_v37 = vmax.f32 %v1312_v19, 0.0  ;;  %v1134_v23 = vadd.f32 %v1133_v22, %v1045_v20  ;;  %v1313_v24 = vpop.f32.mrf.mxu1  ;;  %1535 = vadd.xlane.f32.xlu2 %v1534_v39 }
 0x1c9   : > { %v1382_v46 = vmax.f32 %v1134_v23, 0.0  ;;  %v1456_v21 = vmul.f32 %v3035_v10, %v1383_v37 }
 0x1ca   : > { %v1224_v25 = vpop.f32.mrf.mxu0  ;;  %v1494_v31 = vpop.xlane.xlu1 %1493 }
 0x1cb   : > { %v1455_v2 = vmul.f32 %v3033_v7, %v1382_v46  ;;  %v1225_v33 = vadd.f32 %v1224_v25, %v3021_v49  ;;  %v1586_v27 = vadd.f32 %v3136_v42, %v1494_v31 }
 0x1cc   : > { %v1046_v28 = vpop.f32.mrf.mxu2 }
 0x1cd   : > { %v1314_v30 = vadd.f32 %v1313_v24, %v1225_v33  ;;  %1619 = vst.msk [vmem:[%s3142_s26 + $0x18] sm:$0xff] %vm1615_vm1, %v1586_v27  ;;  %v1047_v32 = vadd.f32 %v1046_v28, %v3023_v53  ;;  %v1135_v55 = vpop.f32.mrf.mxu3  ;;  %v1537_v35 = vadd.f32 %v1456_v21, %v1455_v2 }
 0x1cf   : > { %v1385_v5 = vmax.f32 %v1314_v30, 0.0  ;;  %v1136_v40 = vadd.f32 %v1135_v55, %v1047_v32  ;;  %v1316_v43 = vpop.f32.mrf.mxu1  ;;  %1538 = vadd.xlane.f32.xlu0 %v1537_v35 }
 0x1d1   : > { %v1384_v8 = vmax.f32 %v1136_v40, 0.0  ;;  %v1458_v16 = vmul.f32 %v3035_v10, %v1385_v5 }
 0x1d2   : > { %v1227_v44 = vpop.f32.mrf.mxu0  ;;  %v1497_v45 = vpop.xlane.xlu2 %1496 }
 0x1d3   : > { %v1457_v48 = vmul.f32 %v3033_v7, %v1384_v8  ;;  %v1228_v51 = vadd.f32 %v1227_v44, %v3021_v49  ;;  %v1587_v9 = vadd.f32 %v3136_v42, %v1497_v45 }
 0x1d4   : > { %v1049_v61 = vpop.f32.mrf.mxu2 }
 0x1d5   : > { %v1317_v29 = vadd.f32 %v1316_v43, %v1228_v51  ;;  %1620 = vst.msk [vmem:[%s3142_s26 + $0x20] sm:$0xff] %vm1615_vm1, %v1587_v9  ;;  %v1050_v54 = vadd.f32 %v1049_v61, %v3023_v53  ;;  %v1138_v56 = vpop.f32.mrf.mxu3  ;;  %v1540_v57 = vadd.f32 %v1458_v16, %v1457_v48 }
 0x1d7   : > { %v1387_v36 = vmax.f32 %v1317_v29, 0.0  ;;  %v1139_v58 = vadd.f32 %v1138_v56, %v1050_v54  ;;  %v1318_v59 = vpop.f32.mrf.mxu1  ;;  %1541 = vadd.xlane.f32.xlu1 %v1540_v57 }
 0x1d9   : > { %v1386_v60 = vmax.f32 %v1139_v58, 0.0  ;;  %v1460_v34 = vmul.f32 %v3035_v10, %v1387_v36 }
 0x1da   : > { %v1229_v62 = vpop.f32.mrf.mxu0  ;;  %v1500_v0 = vpop.xlane.xlu2 %1499 }
 0x1db   : > { %v1459_v1 = vmul.f32 %v3033_v7, %v1386_v60  ;;  %v1230_v13 = vadd.f32 %v1229_v62, %v3021_v49  ;;  %v1588_v3 = vadd.f32 %v3136_v42, %v1500_v0 }
 0x1dc   : > { %v1051_v4 = vpop.f32.mrf.mxu2 }
 0x1dd   : > { %v1319_v6 = vadd.f32 %v1318_v59, %v1230_v13  ;;  %1621 = vst.msk [vmem:[%s3142_s26 + $0x28] sm:$0xff] %vm1615_vm1, %v1588_v3  ;;  %v1052_v52 = vadd.f32 %v1051_v4, %v3023_v53  ;;  %v1140_v26 = vpop.f32.mrf.mxu3  ;;  %v1543_v38 = vadd.f32 %v1460_v34, %v1459_v1 }
 0x1df   : > { %v1389_v14 = vmax.f32 %v1319_v6, 0.0  ;;  %v1141_v41 = vadd.f32 %v1140_v26, %v1052_v52  ;;  %v1321_v63 = vpop.f32.mrf.mxu1  ;;  %1544 = vadd.xlane.f32.xlu2 %v1543_v38 }
 0x1e1   : > { %v1388_v47 = vmax.f32 %v1141_v41, 0.0  ;;  %v1462_v18 = vmul.f32 %v3035_v10, %v1389_v14 }
 0x1e2   : > { %v1232_v11 = vpop.f32.mrf.mxu0  ;;  %v1503_v50 = vpop.xlane.xlu0 %1502 }
 0x1e3   : > { %v1461_v12 = vmul.f32 %v3033_v7, %v1388_v47  ;;  %v1233_v15 = vadd.f32 %v1232_v11, %v3021_v49  ;;  %v1589_v17 = vadd.f32 %v3136_v42, %v1503_v50 }
 0x1e4   : > { %v1054_v19 = vpop.f32.mrf.mxu2 }
 0x1e5   : > { %v1322_v20 = vadd.f32 %v1321_v63, %v1233_v15  ;;  %1622 = vst.msk [vmem:[%s3142_s26 + $0x30] sm:$0xff] %vm1615_vm1, %v1589_v17  ;;  %v1055_v22 = vadd.f32 %v1054_v19, %v3023_v53  ;;  %v1143_v39 = vpop.f32.mrf.mxu3  ;;  %v1546_v37 = vadd.f32 %v1462_v18, %v1461_v12 }
 0x1e7   : > { %v1391_v23 = vmax.f32 %v1322_v20, 0.0  ;;  %v1144_v24 = vadd.f32 %v1143_v39, %v1055_v22  ;;  %v1323_v46 = vpop.f32.mrf.mxu1  ;;  %1547 = vadd.xlane.f32.xlu0 %v1546_v37 }
 0x1e9   : > { %v1390_v25 = vmax.f32 %v1144_v24, 0.0  ;;  %v1464_v28 = vmul.f32 %v3035_v10, %v1391_v23 }
 0x1ea   : > { %v1234_v31 = vpop.f32.mrf.mxu0  ;;  %v1506_v2 = vpop.xlane.xlu1 %1505 }
 0x1eb   : > { %v1463_v33 = vmul.f32 %v3033_v7, %v1390_v25  ;;  %v1235_v27 = vadd.f32 %v1234_v31, %v3021_v49  ;;  %v1590_v21 = vadd.f32 %v3136_v42, %v1506_v2 }
 0x1ec   : > { %v1056_v30 = vpop.f32.mrf.mxu2 }
 0x1ed   : > { %v1324_v32 = vadd.f32 %v1323_v46, %v1235_v27  ;;  %1623 = vst.msk [vmem:[%s3142_s26 + $0x38] sm:$0xff] %vm1615_vm1, %v1590_v21  ;;  %v1057_v55 = vadd.f32 %v1056_v30, %v3023_v53  ;;  %v1145_v35 = vpop.f32.mrf.mxu3  ;;  %v1549_v5 = vadd.f32 %v1464_v28, %v1463_v33 }
 0x1ef   : > { %v1393_v40 = vmax.f32 %v1324_v32, 0.0  ;;  %v1146_v43 = vadd.f32 %v1145_v35, %v1057_v55  ;;  %v1326_v8 = vpop.f32.mrf.mxu1  ;;  %1550 = vadd.xlane.f32.xlu1 %v1549_v5 }
 0x1f1   : > { %v1392_v44 = vmax.f32 %v1146_v43, 0.0  ;;  %v1466_v61 = vmul.f32 %v3035_v10, %v1393_v40 }
 0x1f2   : > { %v1237_v45 = vpop.f32.mrf.mxu0  ;;  %v1509_v48 = vpop.xlane.xlu2 %1508 }
 0x1f3   : > { %v1465_v51 = vmul.f32 %v3033_v7, %v1392_v44  ;;  %v1238_v9 = vadd.f32 %v1237_v45, %v3021_v49  ;;  %v1591_v16 = vadd.f32 %v3136_v42, %v1509_v48 }
 0x1f4   : > { %v1059_v29 = vpop.f32.mrf.mxu2 }
 0x1f5   : > { %v1327_v54 = vadd.f32 %v1326_v8, %v1238_v9  ;;  %1624 = vst.msk [vmem:[%s3142_s26 + $0x40] sm:$0xff] %vm1615_vm1, %v1591_v16  ;;  %v1060_v56 = vadd.f32 %v1059_v29, %v3023_v53  ;;  %v1148_v57 = vpop.f32.mrf.mxu3  ;;  %v1552_v36 = vadd.f32 %v1466_v61, %v1465_v51 }
 0x1f7   : > { %v1395_v58 = vmax.f32 %v1327_v54, 0.0  ;;  %v1149_v59 = vadd.f32 %v1148_v57, %v1060_v56  ;;  %v1328_v60 = vpop.f32.mrf.mxu1  ;;  %1553 = vadd.xlane.f32.xlu2 %v1552_v36 }
 0x1f9   : > { %v1394_v62 = vmax.f32 %v1149_v59, 0.0  ;;  %v1468_v4 = vmul.f32 %v3035_v10, %v1395_v58 }
 0x1fa   : > { %v1239_v0 = vpop.f32.mrf.mxu0  ;;  %v1512_v1 = vpop.xlane.xlu0 %1511 }
 0x1fb   : > { %v1467_v13 = vmul.f32 %v3033_v7, %v1394_v62  ;;  %v1240_v3 = vadd.f32 %v1239_v0, %v3021_v49  ;;  %v1592_v34 = vadd.f32 %v3136_v42, %v1512_v1 }
 0x1fc   : > { %v1061_v6 = vpop.f32.mrf.mxu2 }
 0x1fd   : > { %v1329_v52 = vadd.f32 %v1328_v60, %v1240_v3  ;;  %1625 = vst.msk [vmem:[%s3142_s26 + $0x48] sm:$0xff] %vm1615_vm1, %v1592_v34  ;;  %v1062_v26 = vadd.f32 %v1061_v6, %v3023_v53  ;;  %v1150_v38 = vpop.f32.mrf.mxu3  ;;  %v1555_v14 = vadd.f32 %v1468_v4, %v1467_v13 }
 0x1ff   : > { %v1397_v41 = vmax.f32 %v1329_v52, 0.0  ;;  %v1151_v63 = vadd.f32 %v1150_v38, %v1062_v26  ;;  %v1331_v47 = vpop.f32.mrf.mxu1  ;;  %1556 = vadd.xlane.f32.xlu0 %v1555_v14 }
 0x201   : > { %v1396_v11 = vmax.f32 %v1151_v63, 0.0  ;;  %v1470_v19 = vmul.f32 %v3035_v10, %v1397_v41 }
 0x202   : > { %v1242_v50 = vpop.f32.mrf.mxu0  ;;  %v1515_v12 = vpop.xlane.xlu1 %1514 }
 0x203   : > { %v1469_v15 = vmul.f32 %v3033_v7, %v1396_v11  ;;  %v1243_v17 = vadd.f32 %v1242_v50, %v3021_v49  ;;  %v1593_v18 = vadd.f32 %v3136_v42, %v1515_v12 }
 0x204   : > { %v1064_v20 = vpop.f32.mrf.mxu2 }
 0x205   : > { %v1332_v22 = vadd.f32 %v1331_v47, %v1243_v17  ;;  %1626 = vst.msk [vmem:[%s3142_s26 + $0x50] sm:$0xff] %vm1615_vm1, %v1593_v18  ;;  %v1065_v39 = vadd.f32 %v1064_v20, %v3023_v53  ;;  %v1153_v37 = vpop.f32.mrf.mxu3  ;;  %v1558_v23 = vadd.f32 %v1470_v19, %v1469_v15 }
 0x207   : > { %v1399_v24 = vmax.f32 %v1332_v22, 0.0  ;;  %v1154_v46 = vadd.f32 %v1153_v37, %v1065_v39  ;;  %v1333_v25 = vpop.f32.mrf.mxu1  ;;  %1559 = vadd.xlane.f32.xlu1 %v1558_v23 }
 0x209   : > { %v1398_v31 = vmax.f32 %v1154_v46, 0.0  ;;  %v1472_v30 = vmul.f32 %v3035_v10, %v1399_v24 }
 0x20a   : > { %v1244_v2 = vpop.f32.mrf.mxu0  ;;  %v1518_v33 = vpop.xlane.xlu2 %1517 }
 0x20b   : > { %v1471_v27 = vmul.f32 %v3033_v7, %v1398_v31  ;;  %v1245_v21 = vadd.f32 %v1244_v2, %v3021_v49  ;;  %v1594_v28 = vadd.f32 %v3136_v42, %v1518_v33 }
 0x20c   : > { %v1066_v32 = vpop.f32.mrf.mxu2 }
 0x20d   : > { %v1334_v55 = vadd.f32 %v1333_v25, %v1245_v21  ;;  %1627 = vst.msk [vmem:[%s3142_s26 + $0x58] sm:$0xff] %vm1615_vm1, %v1594_v28  ;;  %v1067_v35 = vadd.f32 %v1066_v32, %v3023_v53  ;;  %v1155_v5 = vpop.f32.mrf.mxu3  ;;  %v1561_v40 = vadd.f32 %v1472_v30, %v1471_v27 }
 0x20f   : > { %v1401_v43 = vmax.f32 %v1334_v55, 0.0  ;;  %v1156_v8 = vadd.f32 %v1155_v5, %v1067_v35  ;;  %1562 = vadd.xlane.f32.xlu2 %v1561_v40  ;;  %v1336_v45 = vpop.f32.mrf.mxu1 }
 0x211   : > { %v1400_v44 = vmax.f32 %v1156_v8, 0.0  ;;  %v1474_v29 = vmul.f32 %v3035_v10, %v1401_v43 }
 0x212   : > { %v1247_v48 = vpop.f32.mrf.mxu0  ;;  %v1521_v51 = vpop.xlane.xlu0 %1520 }
 0x213   : > { %v1473_v9 = vmul.f32 %v3033_v7, %v1400_v44  ;;  %v1248_v16 = vadd.f32 %v1247_v48, %v3021_v49  ;;  %v1595_v61 = vadd.f32 %v3136_v42, %v1521_v51 }
 0x214   : > { %v1069_v54 = vpop.f32.mrf.mxu2 }
 0x215   : > { %v1337_v56 = vadd.f32 %v1336_v45, %v1248_v16  ;;  %1628 = vst.msk [vmem:[%s3142_s26 + $0x60] sm:$0xff] %vm1615_vm1, %v1595_v61  ;;  %v1070_v57 = vadd.f32 %v1069_v54, %v3023_v53  ;;  %v1158_v36 = vpop.f32.mrf.mxu3  ;;  %v1564_v58 = vadd.f32 %v1474_v29, %v1473_v9 }
 0x217   : > { %v1403_v59 = vmax.f32 %v1337_v56, 0.0  ;;  %v1159_v60 = vadd.f32 %v1158_v36, %v1070_v57  ;;  %1565 = vadd.xlane.f32.xlu0 %v1564_v58  ;;  %v1338_v6 = vpop.f32.mrf.mxu1 }
 0x219   : > { %v1402_v62 = vmax.f32 %v1159_v60, 0.0  ;;  %v1476_v4 = vmul.f32 %v3035_v10, %v1403_v59 }
 0x21a   : > { %v1249_v0 = vpop.f32.mrf.mxu0  ;;  %v1524_v1 = vpop.xlane.xlu1 %1523 }
 0x21b   : > { %v1475_v13 = vmul.f32 %v3033_v7, %v1402_v62  ;;  %v1250_v3 = vadd.f32 %v1249_v0, %v3021_v49  ;;  %v1596_v34 = vadd.f32 %v3136_v42, %v1524_v1 }
 0x21c   : > { %v1071_v52 = vpop.f32.mrf.mxu2 }
 0x21d   : > { %v1339_v26 = vadd.f32 %v1338_v6, %v1250_v3  ;;  %1629 = vst.msk [vmem:[%s3142_s26 + $0x68] sm:$0xff] %vm1615_vm1, %v1596_v34  ;;  %v1072_v38 = vadd.f32 %v1071_v52, %v3023_v53  ;;  %v1567_v14 = vadd.f32 %v1476_v4, %v1475_v13  ;;  %v1160_v41 = vpop.f32.mrf.mxu3 }
 0x21f   : > { %v1405_v63 = vmax.f32 %v1339_v26, 0.0  ;;  %v1161_v47 = vadd.f32 %v1160_v41, %v1072_v38  ;;  %1568 = vadd.xlane.f32.xlu1 %v1567_v14  ;;  %v1341_v31 = vpop.f32.mrf.mxu1 }
 0x221   : > { %v1404_v11 = vmax.f32 %v1161_v47, 0.0  ;;  %v1478_v17 = vmul.f32 %v3035_v10, %v1405_v63 }
 0x222   : > { %v1527_v50 = vpop.xlane.xlu2 %1526 }
 0x223   : > { %v1477_v12 = vmul.f32 %v3033_v7, %v1404_v11  ;;  %v1597_v15 = vadd.f32 %v3136_v42, %v1527_v50 }
 0x224   : > { %v1074_v18 = vpop.f32.mrf.mxu2 }
 0x225   : > { %1630 = vst.msk [vmem:[%s3142_s26 + $0x70] sm:$0xff] %vm1615_vm1, %v1597_v15  ;;  %v1570_v19 = vadd.f32 %v1478_v17, %v1477_v12  ;;  %v1075_v37 = vadd.f32 %v1074_v18, %v3023_v53  ;;  %v1163_v23 = vpop.f32.mrf.mxu3 }
 0x227   : > { %1571 = vadd.xlane.f32.xlu2 %v1570_v19  ;;  %v1164_v46 = vadd.f32 %v1163_v23, %v1075_v37 }
 0x229   : > { %v1406_v27 = vmax.f32 %v1164_v46, 0.0 }
 0x22a   : > { %v1530_v20 = vpop.xlane.xlu0 %1529 }
 0x22b   : > { %v1598_v22 = vadd.f32 %v3136_v42, %v1530_v20  ;;  %v1479_v35 = vmul.f32 %v3033_v7, %v1406_v27 }
 0x22c   : > { %v1076_v39 = vpop.f32.mrf.mxu2 }
 0x22d   : > { %1631 = vst.msk [vmem:[%s3142_s26 + $0x78] sm:$0xff] %vm1615_vm1, %v1598_v22  ;;  %v1077_v21 = vadd.f32 %v1076_v39, %v3023_v53  ;;  %v1165_v32 = vpop.f32.mrf.mxu3  ;;  %v1343_v53 = vpop.f32.mrf.mxu1 }
 0x22f   : > { %v1166_v5 = vadd.f32 %v1165_v32, %v1077_v21 }
 0x231   : > { %v1408_v48 = vmax.f32 %v1166_v5, 0.0 }
 0x232   : > { %v1533_v24 = vpop.xlane.xlu1 %1532 }
 0x233   : > { %v1599_v25 = vadd.f32 %v3136_v42, %v1533_v24  ;;  %v1481_v61 = vmul.f32 %v3033_v7, %v1408_v48 }
 0x234   : > { %v1252_v2 = vpop.f32.mrf.mxu2 }
 0x235   : > { %1632 = vst.msk [vmem:[%s3142_s26 + $0x80] sm:$0xff] %vm1615_vm1, %v1599_v25  ;;  %v1253_v33 = vadd.f32 %v1252_v2, %v3021_v49 }
 0x237   : > { %v1342_v28 = vadd.f32 %v1341_v31, %v1253_v33 }
 0x239   : > { %v1407_v30 = vmax.f32 %v1342_v28, 0.0 }
 0x23a   : > { %v1536_v55 = vpop.xlane.xlu2 %1535 }
 0x23b   : > { %v1600_v40 = vadd.f32 %v3136_v42, %v1536_v55  ;;  %v1480_v43 = vmul.f32 %v3035_v10, %v1407_v30 }
 0x23c   : > { %v1254_v8 = vpop.f32.mrf.mxu2 }
 0x23d   : > { %1633 = vst.msk [vmem:[%s3142_s26 + $0x88] sm:$0xff] %vm1615_vm1, %v1600_v40  ;;  %v1255_v44 = vadd.f32 %v1254_v8, %v3021_v49  ;;  %v1573_v45 = vadd.f32 %v1480_v43, %v1479_v35 }
 0x23f   : > { %v1344_v51 = vadd.f32 %v1343_v53, %v1255_v44  ;;  %1574 = vadd.xlane.f32.xlu0 %v1573_v45 }
 0x241   : > { %v1409_v9 = vmax.f32 %v1344_v51, 0.0 }
 0x242   : > { %v1539_v16 = vpop.xlane.xlu0 %1538 }
 0x243   : > { %v1601_v29 = vadd.f32 %v3136_v42, %v1539_v16  ;;  %v1482_v54 = vmul.f32 %v3035_v10, %v1409_v9 }
 0x245   : > { %1634 = vst.msk [vmem:[%s3142_s26 + $0x90] sm:$0xff] %vm1615_vm1, %v1601_v29  ;;  %v1576_v49 = vadd.f32 %v1482_v54, %v1481_v61 }
 0x247   : > { %1577 = vadd.xlane.f32.xlu1 %v1576_v49 }
 0x24a   : > { %v1542_v56 = vpop.xlane.xlu1 %1541 }
 0x24b   : > { %v1602_v57 = vadd.f32 %v3136_v42, %v1542_v56 }
 0x24d   : > { %1635 = vst.msk [vmem:[%s3142_s26 + $0x98] sm:$0xff] %vm1615_vm1, %v1602_v57 }
 0x252   : > { %v1545_v36 = vpop.xlane.xlu2 %1544 }
 0x253   : > { %v1603_v58 = vadd.f32 %v3136_v42, %v1545_v36 }
 0x255   : > { %1636 = vst.msk [vmem:[%s3142_s26 + $0xa0] sm:$0xff] %vm1615_vm1, %v1603_v58 }
 0x25a   : > { %v1548_v7 = vpop.xlane.xlu0 %1547 }
 0x25b   : > { %v1604_v10 = vadd.f32 %v3136_v42, %v1548_v7 }
 0x25d   : > { %1637 = vst.msk [vmem:[%s3142_s26 + $0xa8] sm:$0xff] %vm1615_vm1, %v1604_v10 }
 0x262   : > { %v1551_v59 = vpop.xlane.xlu1 %1550 }
 0x263   : > { %v1605_v60 = vadd.f32 %v3136_v42, %v1551_v59 }
 0x265   : > { %1638 = vst.msk [vmem:[%s3142_s26 + $0xb0] sm:$0xff] %vm1615_vm1, %v1605_v60 }
 0x26a   : > { %v1554_v62 = vpop.xlane.xlu2 %1553 }
 0x26b   : > { %v1606_v0 = vadd.f32 %v3136_v42, %v1554_v62 }
 0x26d   : > { %1639 = vst.msk [vmem:[%s3142_s26 + $0xb8] sm:$0xff] %vm1615_vm1, %v1606_v0 }
 0x272   : > { %v1557_v1 = vpop.xlane.xlu0 %1556 }
 0x273   : > { %v1607_v13 = vadd.f32 %v3136_v42, %v1557_v1 }
 0x275   : > { %1640 = vst.msk [vmem:[%s3142_s26 + $0xc0] sm:$0xff] %vm1615_vm1, %v1607_v13 }
 0x27a   : > { %v1560_v3 = vpop.xlane.xlu1 %1559 }
 0x27b   : > { %v1608_v34 = vadd.f32 %v3136_v42, %v1560_v3 }
 0x27d   : > { %1641 = vst.msk [vmem:[%s3142_s26 + $0xc8] sm:$0xff] %vm1615_vm1, %v1608_v34 }
 0x282   : > { %v1563_v4 = vpop.xlane.xlu2 %1562 }
 0x283   : > { %v1609_v6 = vadd.f32 %v3136_v42, %v1563_v4 }
 0x285   : > { %1642 = vst.msk [vmem:[%s3142_s26 + $0xd0] sm:$0xff] %vm1615_vm1, %v1609_v6 }
 0x28a   : > { %v1566_v52 = vpop.xlane.xlu0 %1565 }
 0x28b   : > { %v1610_v26 = vadd.f32 %v3136_v42, %v1566_v52 }
 0x28d   : > { %1643 = vst.msk [vmem:[%s3142_s26 + $0xd8] sm:$0xff] %vm1615_vm1, %v1610_v26 }
 0x292   : > { %v1569_v38 = vpop.xlane.xlu1 %1568 }
 0x293   : > { %v1611_v14 = vadd.f32 %v3136_v42, %v1569_v38 }
 0x295   : > { %1644 = vst.msk [vmem:[%s3142_s26 + $0xe0] sm:$0xff] %vm1615_vm1, %v1611_v14 }
 0x29a   : > { %v1572_v41 = vpop.xlane.xlu2 %1571 }
 0x29b   : > { %v1612_v63 = vadd.f32 %v3136_v42, %v1572_v41 }
 0x29d   : > { %1645 = vst.msk [vmem:[%s3142_s26 + $0xe8] sm:$0xff] %vm1615_vm1, %v1612_v63 }
 0x2b2   : > { %v1575_v47 = vpop.xlane.xlu0 %1574 }
 0x2b3   : > { %v1613_v11 = vadd.f32 %v3136_v42, %v1575_v47 }
 0x2b5   : > { %1646 = vst.msk [vmem:[%s3142_s26 + $0xf0] sm:$0xff] %vm1615_vm1, %v1613_v11 }
 0x2b9   : > { %1654 = sbr.rel (!%p2588_p4) target bundleno = 766 (0x2fe), region = 52 }
 0x2ba   : > { %v1578_v50 = vpop.xlane.xlu1 %1577 }
 0x2bb   : > { %v1614_v12 = vadd.f32 %v3136_v42, %v1578_v50 }
 0x2bd   : > { %1647 = vst.msk [vmem:[%s3142_s26 + $0xf8] sm:$0xff] %vm1615_vm1, %v1614_v12 }
 0x2be   : > { %s3462_s20 = smov (!%p1657_p8, %s1656_s20), 32 }
 0x2bf   : > { %s2253_s28 = sshll.u32 %s3462_s20, 3 }
 0x2c0   : > { %p2256_p9 = scmp.eq.s32.totalorder %s2253_s28, 0 }
 0x2c1   : > { %s3315_s30 = sshrl.u32 (!%p2256_p9), %s3462_s20, 5 }
 0x2c2   : > { %1665 = sbr.rel (%p2256_p9) target bundleno = 766 (0x2fe), region = 56  ;;  %p2257_p10 = scmp.le.s32.totalorder (!%p2256_p9), %s3315_s30, 0 }
 0x2c7   : > { %1944 = sbr.rel (%p2257_p10) target bundleno = 749 (0x2ed), region = 132  ;;  %s3453_s6 = smov (!%p2257_p10), %s3309_s25 }
 0x2c8   : > { %s3454_s10 = smov (!%p2257_p10), %s3142_s26  ;;  %s3324_s17 = smov (!%p2257_p10), 0  }
 0x2c9   : > { %s3326_s8 = smov (!%p2257_p10), 0  }
 0x2cc LB: >> { %v1790_v42 = vld [vmem:[%s2494_s10] sm:$0xff]  ;;  %v1792_v15 = vld [vmem:[%s2494_s10 + $0x8] sm:$0xff]  ;;  %v1794_v17 = vld [vmem:[%s2494_s10 + $0x10] sm:$0xff]  ;;  %s1854_s11 = sadd.s32 1, %s2498_s17  ;;  %s1784_s8 = sadd.s32 1, %s2502_s8   ;;  %s2502_s8 = sphi %s3326_s8, %s1784_s8   ;;  %s2498_s17 = sphi %s3324_s17, %s3457_s17   ;;  %s2494_s10 = sphi %s3454_s10, %s3456_s10   ;;  %s2490_s6 = sphi %s3453_s6, %s3455_s6  }
 0x2cd   : >> { %1791 = vst [vmem:[%s2490_s6] sm:$0xff] %v1790_v42  ;;  %v1796_v18 = vld [vmem:[%s2494_s10 + $0x18] sm:$0xff]  ;;  %p1855_p11 = scmp.ge.s32.totalorder %s1854_s11, %s3315_s30  ;;  %v1798_v19 = vld [vmem:[%s2494_s10 + $0x20] sm:$0xff]  ;;  %v1800_v20 = vld [vmem:[%s2494_s10 + $0x28] sm:$0xff]  ;;  %p1783_p12 = scmp.ge.s32.totalorder %s1784_s8, %s3315_s30 }
 0x2ce   : >> { %1793 = vst [vmem:[%s2490_s6 + $0x8] sm:$0xff] %v1792_v15  ;;  %v1802_v22 = vld [vmem:[%s2494_s10 + $0x30] sm:$0xff]  ;;  %v1804_v39 = vld [vmem:[%s2494_s10 + $0x38] sm:$0xff]  ;;  %v1806_v37 = vld [vmem:[%s2494_s10 + $0x40] sm:$0xff] }
 0x2cf   : >> { %1795 = vst [vmem:[%s2490_s6 + $0x10] sm:$0xff] %v1794_v17  ;;  %s3464_s11 = smov (%p1855_p11, %s1854_s11), 0  ;;  %v1808_v23 = vld [vmem:[%s2494_s10 + $0x48] sm:$0xff]  ;;  %v1810_v24 = vld [vmem:[%s2494_s10 + $0x50] sm:$0xff]  ;;  %v1812_v46 = vld [vmem:[%s2494_s10 + $0x58] sm:$0xff] }
 0x2d0   : >> { %1797 = vst [vmem:[%s2490_s6 + $0x18] sm:$0xff] %v1796_v18  ;;  %s2258_s12 = sshll.u32 %s3464_s11, 8  ;;  %v1814_v25 = vld [vmem:[%s2494_s10 + $0x60] sm:$0xff]  ;;  %v1816_v31 = vld [vmem:[%s2494_s10 + $0x68] sm:$0xff]  ;;  %v1818_v2 = vld [vmem:[%s2494_s10 + $0x70] sm:$0xff]  ;;  %s3457_s17 = smov %s3464_s11 }
 0x2d1   : >> { %1799 = vst [vmem:[%s2490_s6 + $0x20] sm:$0xff] %v1798_v19  ;;  %s3358_s13 = scalar_lea.vmem %s3142_s26, %s2258_s12 [#allocation3]   ;;  %s3361_s21 = scalar_lea.vmem %s3309_s25, %s2258_s12   ;;  %v1820_v33 = vld [vmem:[%s2494_s10 + $0x78] sm:$0xff]  ;;  %v1822_v27 = vld [vmem:[%s2494_s10 + $0x80] sm:$0xff]  ;;  %v1824_v21 = vld [vmem:[%s2494_s10 + $0x88] sm:$0xff] }
 0x2d2   : >> { %1801 = vst [vmem:[%s2490_s6 + $0x28] sm:$0xff] %v1800_v20  ;;  %v1826_v28 = vld [vmem:[%s2494_s10 + $0x90] sm:$0xff]  ;;  %v1828_v30 = vld [vmem:[%s2494_s10 + $0x98] sm:$0xff]  ;;  %v1830_v32 = vld [vmem:[%s2494_s10 + $0xa0] sm:$0xff] }
 0x2d3   : >> { %1803 = vst [vmem:[%s2490_s6 + $0x30] sm:$0xff] %v1802_v22  ;;  %v1832_v55 = vld [vmem:[%s2494_s10 + $0xa8] sm:$0xff]  ;;  %v1834_v35 = vld [vmem:[%s2494_s10 + $0xb0] sm:$0xff]  ;;  %v1836_v5 = vld [vmem:[%s2494_s10 + $0xb8] sm:$0xff] }
 0x2d4   : >> { %1805 = vst [vmem:[%s2490_s6 + $0x38] sm:$0xff] %v1804_v39  ;;  %v1838_v40 = vld [vmem:[%s2494_s10 + $0xc0] sm:$0xff]  ;;  %v1840_v43 = vld [vmem:[%s2494_s10 + $0xc8] sm:$0xff]  ;;  %v1842_v8 = vld [vmem:[%s2494_s10 + $0xd0] sm:$0xff] }
 0x2d5   : >> { %1807 = vst [vmem:[%s2490_s6 + $0x40] sm:$0xff] %v1806_v37  ;;  %v1844_v44 = vld [vmem:[%s2494_s10 + $0xd8] sm:$0xff]  ;;  %v1846_v45 = vld [vmem:[%s2494_s10 + $0xe0] sm:$0xff]  ;;  %v1848_v53 = vld [vmem:[%s2494_s10 + $0xe8] sm:$0xff] }
 0x2d6   : >> { %1809 = vst [vmem:[%s2490_s6 + $0x48] sm:$0xff] %v1808_v23  ;;  %v1850_v48 = vld [vmem:[%s2494_s10 + $0xf0] sm:$0xff]  ;;  %v1852_v51 = vld [vmem:[%s2494_s10 + $0xf8] sm:$0xff]  ;;  %s3456_s10 = smov %s3358_s13 }
 0x2d7   : >> { %1811 = vst [vmem:[%s2490_s6 + $0x50] sm:$0xff] %v1810_v24 }
 0x2d8   : >> { %1813 = vst [vmem:[%s2490_s6 + $0x58] sm:$0xff] %v1812_v46 }
 0x2d9   : >> { %1815 = vst [vmem:[%s2490_s6 + $0x60] sm:$0xff] %v1814_v25 }
 0x2da   : >> { %1817 = vst [vmem:[%s2490_s6 + $0x68] sm:$0xff] %v1816_v31 }
 0x2db   : >> { %1819 = vst [vmem:[%s2490_s6 + $0x70] sm:$0xff] %v1818_v2 }
 0x2dc   : >> { %1821 = vst [vmem:[%s2490_s6 + $0x78] sm:$0xff] %v1820_v33 }
 0x2dd   : >> { %1823 = vst [vmem:[%s2490_s6 + $0x80] sm:$0xff] %v1822_v27 }
 0x2de   : >> { %1825 = vst [vmem:[%s2490_s6 + $0x88] sm:$0xff] %v1824_v21 }
 0x2df   : >> { %1827 = vst [vmem:[%s2490_s6 + $0x90] sm:$0xff] %v1826_v28 }
 0x2e0   : >> { %1829 = vst [vmem:[%s2490_s6 + $0x98] sm:$0xff] %v1828_v30 }
 0x2e1   : >> { %1831 = vst [vmem:[%s2490_s6 + $0xa0] sm:$0xff] %v1830_v32 }
 0x2e2   : >> { %1833 = vst [vmem:[%s2490_s6 + $0xa8] sm:$0xff] %v1832_v55 }
 0x2e3   : >> { %1835 = vst [vmem:[%s2490_s6 + $0xb0] sm:$0xff] %v1834_v35 }
 0x2e4   : >> { %1837 = vst [vmem:[%s2490_s6 + $0xb8] sm:$0xff] %v1836_v5 }
 0x2e5   : >> { %1839 = vst [vmem:[%s2490_s6 + $0xc0] sm:$0xff] %v1838_v40 }
 0x2e6   : >> { %1841 = vst [vmem:[%s2490_s6 + $0xc8] sm:$0xff] %v1840_v43 }
 0x2e7   : >> { %1843 = vst [vmem:[%s2490_s6 + $0xd0] sm:$0xff] %v1842_v8 }
 0x2e8   : >> { %1845 = vst [vmem:[%s2490_s6 + $0xd8] sm:$0xff] %v1844_v44  ;;  %1786 = sbr.rel (!%p1783_p12) target bundleno = 716 (0x2cc), region = 138 }
 0x2e9   : >> { %1847 = vst [vmem:[%s2490_s6 + $0xe0] sm:$0xff] %v1846_v45 }
 0x2ea   : >> { %1849 = vst [vmem:[%s2490_s6 + $0xe8] sm:$0xff] %v1848_v53 }
 0x2eb   : >> { %1851 = vst [vmem:[%s2490_s6 + $0xf0] sm:$0xff] %v1850_v48 }
 0x2ec   : >> { %1853 = vst [vmem:[%s2490_s6 + $0xf8] sm:$0xff] %v1852_v51  ;;  %s3455_s6 = smov %s3361_s21 }
 0x2ed PF: > { %s3426_s14 = sand.u32 31, %s3462_s20   ;;  %s2325_s15 = sshll.u32 %s3315_s30, 8 }
 0x2ee   : > { %s1865_s16 = scalar_lea.vmem %s3142_s26, %s2325_s15 [#allocation3]   ;;  %s1867_s18 = scalar_lea.vmem %s3309_s25, %s2325_s15  }
 0x2ef   : > { %p2263_p13 = scmp.le.s32.totalorder %s3426_s14, 0 }
 0x2f0   : > { %s2504_s19 = smov (!%p2263_p13), %s1867_s18   ;;  %s2508_s22 = smov (!%p2263_p13), %s1865_s16  }
 0x2f1   : > { %1958 = sbr.rel (%p2263_p13) target bundleno = 766 (0x2fe), region = 143  ;;  %s2512_s23 = smov (!%p2263_p13), 0  }
 0x2f2   : > { %s2516_s24 = smov (!%p2263_p13), 0  }
 0x2f6 LB: >> { %v1877_v9 = vld [vmem:[%s2510_s22] sm:$0xff]  ;;  %s1879_s20 = sadd.s32 1, %s2514_s23  ;;  %s1871_s24 = sadd.s32 1, %s2518_s24   ;;  %s2518_s24 = sphi %s2516_s24, %s1871_s24   ;;  %s2514_s23 = sphi %s2512_s23, %s2513_s23   ;;  %s2510_s22 = sphi %s2508_s22, %s1884_s22   ;;  %s2506_s19 = sphi %s2504_s19, %s1885_s19  }
 0x2f7   : >> { %1878 = vst [vmem:[%s2506_s19] sm:$0xff] %v1877_v9  ;;  %p1880_p0 = scmp.ge.s32.totalorder %s1879_s20, %s3426_s14  ;;  %p1870_p1 = scmp.ge.s32.totalorder %s1871_s24, %s3426_s14 }
 0x2f9   : >> { %s3466_s20 = smov (%p1880_p0, %s1879_s20), 0  ;;  %1873 = sbr.rel (!%p1870_p1) target bundleno = 758 (0x2f6), region = 149 }
 0x2fa   : >> { %s2264_s26 = sshll.u32 %s3466_s20, 3  ;;  %s2513_s23 = smov %s3466_s20  }
 0x2fb   : >> { %s1884_s22 = scalar_lea.vmem %s1865_s16, %s2264_s26 [#allocation3]   ;;  %s1885_s19 = scalar_lea.vmem %s1867_s18, %s2264_s26  }
 0x2fe PF: > { %p16_p2 = scmp.ge.s32.totalorder %s2578_s29, 5   ;;  %s3458_s26 = smov %s2482_s27 }
 0x2ff   : > { %s3459_s27 = smov %s2586_s9  ;;  %s3460_s28 = smov %s2578_s29 }
 0x300   :  { %18 = sbr.rel (!%p16_p2) target bundleno = 5 (0x5), region = 160 }

</bundles_post_ra>
